<compile_context>
chip_gen: v5e
topology: v5e:2x2
jax: 0.10.0
libtpu: 0.0.40
codegen_flags: <defaults>
</compile_context>

<pallas_src>
import functools

import jax
import jax.numpy as jnp
from jax.experimental import pallas as pl
from jax.experimental.pallas import tpu as pltpu

EPS = 1e-5     # torch BatchNorm1d default eps
LEAK = 0.2     # LeakyReLU negative slope
LANE = 128
_PASSES = 2    # 0: layer-2 BN stats, 1: full forward + store


def _round_up(x, m):
    return (x + m - 1) // m * m


def _discriminator_kernel(
    # inputs
    xT_ref,            # (F, TM)      bf16  x^T batch tile (batch on lanes)
    w1_ref,            # (H2P, F)     bf16  torch layout (out, in), zero-padded
    w2_ref,            # (HP, H2P)    bf16
    w3_ref,            # (HP, 1)      f32
    sum1_ref, sumsq1_ref,   # (H2P, 1) f32  analytic batch stats of h1 (wrapper)
    g1_ref, be1_ref,   # (H2P, 1)     f32   BN1 gamma / beta
    g2_ref, be2_ref,   # (HP, 1)      f32   BN2 gamma / beta
    b3_ref,            # (1, 1)       f32
    # outputs
    o_ref,             # (1, TM)      f32   lane-dense sigmoid outputs
    # scratch (persists across the whole grid)
    sum2_ref, sumsq2_ref,     # (HP, 1)  f32
    scale1_ref, shift1_ref,   # (H2P, 1) f32  folded BN1
    scale2_ref, shift2_ref,   # (HP, 1)  f32  folded BN2
    *,
    n_rows, tm,
):
    p = pl.program_id(0)   # pass index (strictly sequential)
    i = pl.program_id(1)   # batch-tile index
    inv_n = jnp.float32(1.0 / n_rows)

    @pl.when(jnp.logical_and(p == 0, i == 0))
    def _init():
        sum2_ref[...] = jnp.zeros_like(sum2_ref)
        sumsq2_ref[...] = jnp.zeros_like(sumsq2_ref)
        # Fold BN1 once: stats came in analytically from the wrapper.
        mu1 = sum1_ref[...] * inv_n
        var1 = jnp.maximum(sumsq1_ref[...] * inv_n - mu1 * mu1, 0.0)
        s1 = g1_ref[...] * jax.lax.rsqrt(var1 + EPS)
        scale1_ref[...] = s1
        shift1_ref[...] = be1_ref[...] - mu1 * s1

    @pl.when(jnp.logical_and(p == 1, i == 0))
    def _fold_bn2():
        mu2 = sum2_ref[...] * inv_n
        var2 = jnp.maximum(sumsq2_ref[...] * inv_n - mu2 * mu2, 0.0)
        s2 = g2_ref[...] * jax.lax.rsqrt(var2 + EPS)
        scale2_ref[...] = s2
        shift2_ref[...] = be2_ref[...] - mu2 * s2

    # ---- Layer 1: (H2P, F) @ (F, TM) -> (H2P, TM); bf16 in, f32 MXU accum.
    # Linear bias b1 dropped: a per-feature constant cancels under BN.
    h1 = jnp.dot(w1_ref[...], xT_ref[...], preferred_element_type=jnp.float32)
    a1 = h1 * scale1_ref[...] + shift1_ref[...]
    a1 = jnp.where(a1 > 0, a1, LEAK * a1)              # LeakyReLU(0.2), f32

    # ---- Layer 2: (HP, H2P) @ (H2P, TM) -> (HP, TM); bf16 in, f32 accum.
    h2 = jnp.dot(w2_ref[...], a1.astype(jnp.bfloat16),
                 preferred_element_type=jnp.float32)

    @pl.when(p == 0)
    def _accum_layer2_stats():
        # Zero out padded batch columns so they cannot pollute the stats
        # (padded x cols give h1 == 0, but a1 == shift1 != 0 there).
        col = i * tm + jax.lax.broadcasted_iota(jnp.int32, (1, tm), 1)
        h2m = jnp.where(col < n_rows, h2, 0.0)
        sum2_ref[...] += jnp.sum(h2m, axis=1, keepdims=True)
        sumsq2_ref[...] += jnp.sum(h2m * h2m, axis=1, keepdims=True)

    @pl.when(p == 1)
    def _final_forward():
        a2 = h2 * scale2_ref[...] + shift2_ref[...]
        a2 = jnp.where(a2 > 0, a2, LEAK * a2)          # (HP, TM) f32
        # Final Linear (H -> 1): VPU multiply + sublane reduce (an MXU matmul
        # would use a single output lane).  Result stays lane-dense.
        logit = jnp.sum(a2 * w3_ref[...], axis=0, keepdims=True) + b3_ref[...]
        o_ref[...] = jax.nn.sigmoid(logit)             # (1, TM)


@jax.jit
def discriminator_forward(x, params):
    """x: (N, input_size). Returns (N,) float32 (== torch output.view(-1))."""
    n, f = x.shape
    h2_dim = params["w1"].shape[0]        # 2 * hidden_size
    h_dim = params["w2"].shape[0]         # hidden_size
    h2p = _round_up(h2_dim, LANE)
    hp = _round_up(h_dim, LANE)

    # Batch tile: multiple of 128 lanes, capped at 1024.  Per-tile footprint at
    # TM=1024 is ~3 MiB of f32 intermediates + the tiny x^T tile -- comfortable
    # on v5e/v6e (128 MiB VMEM) and v7x (64 MiB).
    tm = max(LANE, min(1024, _round_up(n, LANE)))
    n_pad = _round_up(n, tm)
    t = n_pad // tm

    # --- Analytic BN1 batch statistics (layer 1 is linear, bias dropped):
    #   sum_n h1       = W1 @ colsum(x)
    #   sum_n h1^2[j]  = w1[j] @ (x^T x) @ w1[j]^T
    x32 = x.astype(jnp.float32)
    w1f = params["w1"].astype(jnp.float32)
    colsum = jnp.sum(x32, axis=0)                       # (F,)
    gram = x32.T @ x32                                  # (F, F)  tiny
    sum1_v = w1f @ colsum                               # (H2,)
    sumsq1_v = jnp.sum((w1f @ gram) * w1f, axis=1)      # (H2,)

    # --- stage operands (pad + cast).  x is transposed to (F, N_pad) so the
    # batch sits on the lane axis; the transpose fuses with the pad + bf16 cast.
    xT = jnp.zeros((f, n_pad), jnp.bfloat16).at[:, :n].set(
        x.T.astype(jnp.bfloat16))
    w1 = jnp.zeros((h2p, f), jnp.bfloat16).at[:h2_dim, :].set(
        params["w1"].astype(jnp.bfloat16))
    w2 = jnp.zeros((hp, h2p), jnp.bfloat16).at[:h_dim, :h2_dim].set(
        params["w2"].astype(jnp.bfloat16))
    w3 = jnp.zeros((hp, 1), jnp.float32).at[:h_dim, 0].set(
        params["w3"].reshape(-1).astype(jnp.float32))
    sum1 = jnp.zeros((h2p, 1), jnp.float32).at[:h2_dim, 0].set(sum1_v)
    sumsq1 = jnp.zeros((h2p, 1), jnp.float32).at[:h2_dim, 0].set(sumsq1_v)
    g1 = jnp.ones((h2p, 1), jnp.float32).at[:h2_dim, 0].set(
        params["g1"].astype(jnp.float32))
    be1 = jnp.zeros((h2p, 1), jnp.float32).at[:h2_dim, 0].set(
        params["be1"].astype(jnp.float32))
    g2 = jnp.ones((hp, 1), jnp.float32).at[:h_dim, 0].set(
        params["g2"].astype(jnp.float32))
    be2 = jnp.zeros((hp, 1), jnp.float32).at[:h_dim, 0].set(
        params["be2"].astype(jnp.float32))
    b3 = params["b3"].reshape(1, 1).astype(jnp.float32)
    # NOTE: params["b1"] / params["b2"] are intentionally unused -- a constant
    # per-feature bias added before training-mode BatchNorm cancels exactly.

    const = lambda p_, i_: (0, 0)   # resident operands: fetched once
    kernel = functools.partial(_discriminator_kernel, n_rows=n, tm=tm)

    out = pl.pallas_call(
        kernel,
        out_shape=jax.ShapeDtypeStruct((1, n_pad), jnp.float32),
        grid_spec=pltpu.PrefetchScalarGridSpec(
            num_scalar_prefetch=0,
            grid=(_PASSES, t),
            in_specs=[
                pl.BlockSpec((f, tm), lambda p_, i_: (0, i_)),   # x^T: pipelined tiles
                pl.BlockSpec((h2p, f), const),                   # w1 (resident)
                pl.BlockSpec((hp, h2p), const),                  # w2 (resident)
                pl.BlockSpec((hp, 1), const),                    # w3
                pl.BlockSpec((h2p, 1), const),                   # sum1
                pl.BlockSpec((h2p, 1), const),                   # sumsq1
                pl.BlockSpec((h2p, 1), const),                   # gamma1
                pl.BlockSpec((h2p, 1), const),                   # beta1
                pl.BlockSpec((hp, 1), const),                    # gamma2
                pl.BlockSpec((hp, 1), const),                    # beta2
                pl.BlockSpec((1, 1), const),                     # b3
            ],
            # Lane-dense output.  Pass 0 parks on block (0,0) (never flushed
            # with garbage); pass 1 streams real blocks (0, i).
            out_specs=pl.BlockSpec((1, tm), lambda p_, i_: (0, i_ * p_)),
            scratch_shapes=[
                pltpu.VMEM((hp, 1), jnp.float32),    # sum(h2)
                pltpu.VMEM((hp, 1), jnp.float32),    # sum(h2^2)
                pltpu.VMEM((h2p, 1), jnp.float32),   # folded BN1 scale
                pltpu.VMEM((h2p, 1), jnp.float32),   # folded BN1 shift
                pltpu.VMEM((hp, 1), jnp.float32),    # folded BN2 scale
                pltpu.VMEM((hp, 1), jnp.float32),    # folded BN2 shift
            ],
        ),
        compiler_params=pltpu.CompilerParams(
            # Both axes "arbitrary": pass order matters, and BN2 statistics are
            # accumulated in shared scratch across batch tiles.
            dimension_semantics=("arbitrary", "arbitrary"),
            vmem_limit_bytes=32 * 1024 * 1024,
        ),
    )(xT, w1, w2, w3, sum1, sumsq1, g1, be1, g2, be2, b3)

    return out.reshape(-1)[:n]


def discriminator_reference(x, params):
    """Pure-JAX f32 reference of the torch module forward (training-mode BN)."""
    def bn(h, gamma, beta):
        mu = jnp.mean(h, axis=0)
        var = jnp.mean((h - mu) ** 2, axis=0)      # biased variance, like torch
        return gamma * (h - mu) * jax.lax.rsqrt(var + EPS) + beta

    h = x @ params["w1"].T + params["b1"]
    h = bn(h, params["g1"], params["be1"])
    h = jnp.where(h > 0, h, LEAK * h)
    h = h @ params["w2"].T + params["b2"]
    h = bn(h, params["g2"], params["be2"])
    h = jnp.where(h > 0, h, LEAK * h)
    logit = h @ params["w3"].T + params["b3"]
    return jax.nn.sigmoid(logit).reshape(-1)


def init_params(key, input_size, hidden_size):
    """Deterministic synthetic parameters, same shapes/layout as the torch module."""
    h2 = 2 * hidden_size
    ks = jax.random.split(key, 6)

    def lin(kw, kb, fan_in, fan_out):
        bound = 1.0 / jnp.sqrt(fan_in)
        w = jax.random.uniform(kw, (fan_out, fan_in), jnp.float32, -bound, bound)
        b = jax.random.uniform(kb, (fan_out,), jnp.float32, -bound, bound)
        return w, b

    w1, b1 = lin(ks[0], ks[1], input_size, h2)
    w2, b2 = lin(ks[2], ks[3], h2, hidden_size)
    w3, b3 = lin(ks[4], ks[5], hidden_size, 1)
    return {
        "w1": w1, "b1": b1,
        "g1": jnp.ones((h2,), jnp.float32), "be1": jnp.zeros((h2,), jnp.float32),
        "w2": w2, "b2": b2,
        "g2": jnp.ones((hidden_size,), jnp.float32),
        "be2": jnp.zeros((hidden_size,), jnp.float32),
        "w3": w3, "b3": b3,
    }


if __name__ == "__main__":
    key = jax.random.PRNGKey(0)
    k_x, k_p, k_x2, k_p2 = jax.random.split(key, 4)

    # Small demo shapes matching the module defaults.
    input_size, hidden_size, batch = 16, 32, 8
    x = jax.random.normal(k_x, (batch, input_size), dtype=jnp.float32)
    params = init_params(k_p, input_size, hidden_size)

    out = jax.block_until_ready(discriminator_forward(x, params))
    ref = discriminator_reference(x, params)
    assert out.shape == (batch,)
    assert bool(jnp.all(jnp.isfinite(out)))
    assert bool(jnp.all((out >= 0.0) & (out <= 1.0)))
    assert bool(jnp.allclose(out, ref, atol=5e-2, rtol=0.0)), (
        f"max err {float(jnp.max(jnp.abs(out - ref)))}")

    # Larger multi-tile case: exercises batch tiling (3 x 1024-row tiles),
    # padded-column masking and the batch-global layer-2 statistics.
    input_size2, hidden_size2, batch2 = 20, 48, 2300
    x2 = jax.random.normal(k_x2, (batch2, input_size2), dtype=jnp.float32)
    params2 = init_params(k_p2, input_size2, hidden_size2)
    out2 = jax.block_until_ready(discriminator_forward(x2, params2))
    ref2 = discriminator_reference(x2, params2)
    assert out2.shape == (batch2,)
    assert bool(jnp.all(jnp.isfinite(out2)))
    assert bool(jnp.allclose(out2, ref2, atol=5e-2, rtol=0.0)), (
        f"max err {float(jnp.max(jnp.abs(out2 - ref2)))}")

    print("KERNEL_OK")
</pallas_src>

<mosaic_0001>
module attributes {stable_mosaic.version = 11 : i64} {
  func.func @_discriminator_kernel(%arg0: i32, %arg1: i32, %arg2: memref<16x128xbf16, #tpu.memory_space<vmem>>, %arg3: memref<128x16xbf16, #tpu.memory_space<vmem>>, %arg4: memref<128x128xbf16, #tpu.memory_space<vmem>>, %arg5: memref<128x1xf32, #tpu.memory_space<vmem>>, %arg6: memref<128x1xf32, #tpu.memory_space<vmem>>, %arg7: memref<128x1xf32, #tpu.memory_space<vmem>>, %arg8: memref<128x1xf32, #tpu.memory_space<vmem>>, %arg9: memref<128x1xf32, #tpu.memory_space<vmem>>, %arg10: memref<128x1xf32, #tpu.memory_space<vmem>>, %arg11: memref<128x1xf32, #tpu.memory_space<vmem>>, %arg12: memref<1x1xf32, #tpu.memory_space<vmem>>, %arg13: memref<1x128xf32, #tpu.memory_space<vmem>>, %arg14: memref<128x1xf32, #tpu.memory_space<vmem>>, %arg15: memref<128x1xf32, #tpu.memory_space<vmem>>, %arg16: memref<128x1xf32, #tpu.memory_space<vmem>>, %arg17: memref<128x1xf32, #tpu.memory_space<vmem>>, %arg18: memref<128x1xf32, #tpu.memory_space<vmem>>, %arg19: memref<128x1xf32, #tpu.memory_space<vmem>>) attributes {dimension_semantics = [#tpu.dimension_semantics<arbitrary>, #tpu.dimension_semantics<arbitrary>], iteration_bounds = array<i64: 2, 1>, scalar_prefetch = 0 : i64, scratch_operands = 6 : i64, tpu.core_type = #tpu.core_type<tc>, window_params = [{transform_indices = @transform_0, window_bounds = array<i64: 16, 128>}, {pipeline_mode = #tpu.pipeline_mode<synchronous>, transform_indices = @transform_1, window_bounds = array<i64: 128, 16>}, {pipeline_mode = #tpu.pipeline_mode<synchronous>, transform_indices = @transform_2, window_bounds = array<i64: 128, 128>}, {pipeline_mode = #tpu.pipeline_mode<synchronous>, transform_indices = @transform_3, window_bounds = array<i64: 128, 1>}, {pipeline_mode = #tpu.pipeline_mode<synchronous>, transform_indices = @transform_4, window_bounds = array<i64: 128, 1>}, {pipeline_mode = #tpu.pipeline_mode<synchronous>, transform_indices = @transform_5, window_bounds = array<i64: 128, 1>}, {pipeline_mode = #tpu.pipeline_mode<synchronous>, transform_indices = @transform_6, window_bounds = array<i64: 128, 1>}, {pipeline_mode = #tpu.pipeline_mode<synchronous>, transform_indices = @transform_7, window_bounds = array<i64: 128, 1>}, {pipeline_mode = #tpu.pipeline_mode<synchronous>, transform_indices = @transform_8, window_bounds = array<i64: 128, 1>}, {pipeline_mode = #tpu.pipeline_mode<synchronous>, transform_indices = @transform_9, window_bounds = array<i64: 128, 1>}, {pipeline_mode = #tpu.pipeline_mode<synchronous>, transform_indices = @transform_10, window_bounds = array<i64: 1, 1>}, {transform_indices = @transform_11, window_bounds = array<i64: 1, 128>}]} {
    %c0_i32 = arith.constant 0 : i32
    %0 = arith.cmpi eq, %arg0, %c0_i32 : i32
    %c0_i32_0 = arith.constant 0 : i32
    %1 = arith.cmpi eq, %arg1, %c0_i32_0 : i32
    %2 = arith.andi %0, %1 : i1
    %3 = arith.extui %2 : i1 to i32
    %cst = arith.constant 1.250000e-01 : f32
    %c0_i32_1 = arith.constant 0 : i32
    %4 = arith.cmpi ne, %3, %c0_i32_1 : i32
    scf.if %4 {
      %cst_22 = arith.constant 0.000000e+00 : f32
      %33 = vector.broadcast %cst_22 : f32 to vector<128x1xf32>
      %c0_23 = arith.constant 0 : index
      %c0_24 = arith.constant 0 : index
      %34 = vector.load %arg14[%c0_23, %c0_24] : memref<128x1xf32, #tpu.memory_space<vmem>>, vector<128x1xf32>
      tpu.vector_store %arg14[%c0_23, %c0_24], %33 {strides = array<i32>} : memref<128x1xf32, #tpu.memory_space<vmem>>, vector<128x1xf32>,
      %cst_25 = arith.constant 0.000000e+00 : f32
      %35 = vector.broadcast %cst_25 : f32 to vector<128x1xf32>
      %c0_26 = arith.constant 0 : index
      %c0_27 = arith.constant 0 : index
      %36 = vector.load %arg15[%c0_26, %c0_27] : memref<128x1xf32, #tpu.memory_space<vmem>>, vector<128x1xf32>
      tpu.vector_store %arg15[%c0_26, %c0_27], %35 {strides = array<i32>} : memref<128x1xf32, #tpu.memory_space<vmem>>, vector<128x1xf32>,
      %c0_28 = arith.constant 0 : index
      %c0_29 = arith.constant 0 : index
      %37 = vector.load %arg6[%c0_28, %c0_29] : memref<128x1xf32, #tpu.memory_space<vmem>>, vector<128x1xf32>
      %38 = vector.broadcast %cst : f32 to vector<128x1xf32>
      %39 = arith.mulf %37, %38 : vector<128x1xf32>
      %c0_30 = arith.constant 0 : index
      %c0_31 = arith.constant 0 : index
      %40 = vector.load %arg7[%c0_30, %c0_31] : memref<128x1xf32, #tpu.memory_space<vmem>>, vector<128x1xf32>
      %41 = vector.broadcast %cst : f32 to vector<128x1xf32>
      %42 = arith.mulf %40, %41 : vector<128x1xf32>
      %43 = arith.mulf %39, %39 : vector<128x1xf32>
      %44 = arith.subf %42, %43 : vector<128x1xf32>
      %cst_32 = arith.constant 0.000000e+00 : f32
      %45 = vector.broadcast %cst_32 : f32 to vector<128x1xf32>
      %46 = arith.maximumf %44, %45 : vector<128x1xf32>
      %c0_33 = arith.constant 0 : index
      %c0_34 = arith.constant 0 : index
      %47 = vector.load %arg8[%c0_33, %c0_34] : memref<128x1xf32, #tpu.memory_space<vmem>>, vector<128x1xf32>
      %cst_35 = arith.constant 9.99999974E-6 : f32
      %48 = vector.broadcast %cst_35 : f32 to vector<128x1xf32>
      %49 = arith.addf %46, %48 : vector<128x1xf32>
      %50 = math.rsqrt %49 : vector<128x1xf32>
      %51 = arith.mulf %47, %50 : vector<128x1xf32>
      %c0_36 = arith.constant 0 : index
      %c0_37 = arith.constant 0 : index
      %52 = vector.load %arg16[%c0_36, %c0_37] : memref<128x1xf32, #tpu.memory_space<vmem>>, vector<128x1xf32>
      tpu.vector_store %arg16[%c0_36, %c0_37], %51 {strides = array<i32>} : memref<128x1xf32, #tpu.memory_space<vmem>>, vector<128x1xf32>,
      %c0_38 = arith.constant 0 : index
      %c0_39 = arith.constant 0 : index
      %53 = vector.load %arg9[%c0_38, %c0_39] : memref<128x1xf32, #tpu.memory_space<vmem>>, vector<128x1xf32>
      %54 = arith.mulf %39, %51 : vector<128x1xf32>
      %55 = arith.subf %53, %54 : vector<128x1xf32>
      %c0_40 = arith.constant 0 : index
      %c0_41 = arith.constant 0 : index
      %56 = vector.load %arg17[%c0_40, %c0_41] : memref<128x1xf32, #tpu.memory_space<vmem>>, vector<128x1xf32>
      tpu.vector_store %arg17[%c0_40, %c0_41], %55 {strides = array<i32>} : memref<128x1xf32, #tpu.memory_space<vmem>>, vector<128x1xf32>,
    } else {
    }
    %c1_i32 = arith.constant 1 : i32
    %5 = arith.cmpi eq, %arg0, %c1_i32 : i32
    %c0_i32_2 = arith.constant 0 : i32
    %6 = arith.cmpi eq, %arg1, %c0_i32_2 : i32
    %7 = arith.andi %5, %6 : i1
    %8 = arith.extui %7 : i1 to i32
    %cst_3 = arith.constant 1.250000e-01 : f32
    %c0_i32_4 = arith.constant 0 : i32
    %9 = arith.cmpi ne, %8, %c0_i32_4 : i32
    scf.if %9 {
      %c0_22 = arith.constant 0 : index
      %c0_23 = arith.constant 0 : index
      %33 = vector.load %arg14[%c0_22, %c0_23] : memref<128x1xf32, #tpu.memory_space<vmem>>, vector<128x1xf32>
      %34 = vector.broadcast %cst_3 : f32 to vector<128x1xf32>
      %35 = arith.mulf %33, %34 : vector<128x1xf32>
      %c0_24 = arith.constant 0 : index
      %c0_25 = arith.constant 0 : index
      %36 = vector.load %arg15[%c0_24, %c0_25] : memref<128x1xf32, #tpu.memory_space<vmem>>, vector<128x1xf32>
      %37 = vector.broadcast %cst_3 : f32 to vector<128x1xf32>
      %38 = arith.mulf %36, %37 : vector<128x1xf32>
      %39 = arith.mulf %35, %35 : vector<128x1xf32>
      %40 = arith.subf %38, %39 : vector<128x1xf32>
      %cst_26 = arith.constant 0.000000e+00 : f32
      %41 = vector.broadcast %cst_26 : f32 to vector<128x1xf32>
      %42 = arith.maximumf %40, %41 : vector<128x1xf32>
      %c0_27 = arith.constant 0 : index
      %c0_28 = arith.constant 0 : index
      %43 = vector.load %arg10[%c0_27, %c0_28] : memref<128x1xf32, #tpu.memory_space<vmem>>, vector<128x1xf32>
      %cst_29 = arith.constant 9.99999974E-6 : f32
      %44 = vector.broadcast %cst_29 : f32 to vector<128x1xf32>
      %45 = arith.addf %42, %44 : vector<128x1xf32>
      %46 = math.rsqrt %45 : vector<128x1xf32>
      %47 = arith.mulf %43, %46 : vector<128x1xf32>
      %c0_30 = arith.constant 0 : index
      %c0_31 = arith.constant 0 : index
      %48 = vector.load %arg18[%c0_30, %c0_31] : memref<128x1xf32, #tpu.memory_space<vmem>>, vector<128x1xf32>
      tpu.vector_store %arg18[%c0_30, %c0_31], %47 {strides = array<i32>} : memref<128x1xf32, #tpu.memory_space<vmem>>, vector<128x1xf32>,
      %c0_32 = arith.constant 0 : index
      %c0_33 = arith.constant 0 : index
      %49 = vector.load %arg11[%c0_32, %c0_33] : memref<128x1xf32, #tpu.memory_space<vmem>>, vector<128x1xf32>
      %50 = arith.mulf %35, %47 : vector<128x1xf32>
      %51 = arith.subf %49, %50 : vector<128x1xf32>
      %c0_34 = arith.constant 0 : index
      %c0_35 = arith.constant 0 : index
      %52 = vector.load %arg19[%c0_34, %c0_35] : memref<128x1xf32, #tpu.memory_space<vmem>>, vector<128x1xf32>
      tpu.vector_store %arg19[%c0_34, %c0_35], %51 {strides = array<i32>} : memref<128x1xf32, #tpu.memory_space<vmem>>, vector<128x1xf32>,
    } else {
    }
    %c0 = arith.constant 0 : index
    %c0_5 = arith.constant 0 : index
    %10 = vector.load %arg3[%c0, %c0_5] : memref<128x16xbf16, #tpu.memory_space<vmem>>, vector<128x16xbf16>
    %c0_6 = arith.constant 0 : index
    %c0_7 = arith.constant 0 : index
    %11 = vector.load %arg2[%c0_6, %c0_7] : memref<16x128xbf16, #tpu.memory_space<vmem>>, vector<16x128xbf16>
    %cst_8 = arith.constant dense<0.000000e+00> : vector<128x128xf32>
    %12 = tpu.matmul %10, %11, %cst_8 {dimension_numbers = #tpu.dot_dimension_numbers<[1], [0], [0], [1], [0, 0, 1, 1], [], []>} : vector<128x16xbf16>, vector<16x128xbf16>, vector<128x128xf32> -> vector<128x128xf32>
    %c0_9 = arith.constant 0 : index
    %c0_10 = arith.constant 0 : index
    %13 = vector.load %arg16[%c0_9, %c0_10] : memref<128x1xf32, #tpu.memory_space<vmem>>, vector<128x1xf32>
    %14 = vector.broadcast %13 : vector<128x1xf32> to vector<128x128xf32>
    %15 = arith.mulf %12, %14 : vector<128x128xf32>
    %c0_11 = arith.constant 0 : index
    %c0_12 = arith.constant 0 : index
    %16 = vector.load %arg17[%c0_11, %c0_12] : memref<128x1xf32, #tpu.memory_space<vmem>>, vector<128x1xf32>
    %17 = vector.broadcast %16 : vector<128x1xf32> to vector<128x128xf32>
    %18 = arith.addf %15, %17 : vector<128x128xf32>
    %cst_13 = arith.constant 0.000000e+00 : f32
    %19 = vector.broadcast %cst_13 : f32 to vector<128x128xf32>
    %20 = arith.cmpf ogt, %18, %19 : vector<128x128xf32>
    %cst_14 = arith.constant 2.000000e-01 : f32
    %21 = vector.broadcast %cst_14 : f32 to vector<128x128xf32>
    %22 = arith.mulf %21, %18 : vector<128x128xf32>
    %23 = arith.select %20, %18, %22 : vector<128x128xi1>, vector<128x128xf32>
    %c0_15 = arith.constant 0 : index
    %c0_16 = arith.constant 0 : index
    %24 = vector.load %arg4[%c0_15, %c0_16] : memref<128x128xbf16, #tpu.memory_space<vmem>>, vector<128x128xbf16>
    %25 = arith.truncf %23 : vector<128x128xf32> to vector<128x128xbf16>
    %cst_17 = arith.constant dense<0.000000e+00> : vector<128x128xf32>
    %26 = tpu.matmul %24, %25, %cst_17 {dimension_numbers = #tpu.dot_dimension_numbers<[1], [0], [0], [1], [0, 0, 1, 1], [], []>} : vector<128x128xbf16>, vector<128x128xbf16>, vector<128x128xf32> -> vector<128x128xf32>
    %c0_i32_18 = arith.constant 0 : i32
    %27 = arith.cmpi eq, %arg0, %c0_i32_18 : i32
    %28 = arith.extui %27 : i1 to i32
    %c0_i32_19 = arith.constant 0 : i32
    %29 = arith.cmpi ne, %28, %c0_i32_19 : i32
    scf.if %29 {
      %c128_i32 = arith.constant 128 : i32
      %33 = arith.muli %arg1, %c128_i32 : i32
      %34 = tpu.iota {dimensions = array<i32: 1>} : vector<1x128xi32>
      %35 = vector.broadcast %33 : i32 to vector<1x128xi32>
      %36 = arith.addi %35, %34 : vector<1x128xi32>
      %c8_i32 = arith.constant 8 : i32
      %37 = vector.broadcast %c8_i32 : i32 to vector<1x128xi32>
      %38 = arith.cmpi slt, %36, %37 : vector<1x128xi32>
      %cst_22 = arith.constant 0.000000e+00 : f32
      %39 = vector.shape_cast %38 : vector<1x128xi1> to vector<1x128xi1>
      %40 = vector.broadcast %39 : vector<1x128xi1> to vector<128x128xi1>
      %41 = vector.broadcast %cst_22 : f32 to vector<128x128xf32>
      %42 = arith.select %40, %26, %41 : vector<128x128xi1>, vector<128x128xf32>
      %c0_23 = arith.constant 0 : index
      %c0_24 = arith.constant 0 : index
      %43 = vector.load %arg14[%c0_23, %c0_24] : memref<128x1xf32, #tpu.memory_space<vmem>>, vector<128x1xf32>
      %cst_25 = arith.constant dense<0.000000e+00> : vector<128xf32>
      %44 = vector.multi_reduction <add>, %42, %cst_25 [1] : vector<128x128xf32> to vector<128xf32>
      %45 = vector.shape_cast %44 : vector<128xf32> to vector<128x1xf32>
      %46 = arith.addf %43, %45 : vector<128x1xf32>
      %c0_26 = arith.constant 0 : index
      %c0_27 = arith.constant 0 : index
      %47 = vector.load %arg14[%c0_26, %c0_27] : memref<128x1xf32, #tpu.memory_space<vmem>>, vector<128x1xf32>
      tpu.vector_store %arg14[%c0_26, %c0_27], %46 {strides = array<i32>} : memref<128x1xf32, #tpu.memory_space<vmem>>, vector<128x1xf32>,
      %c0_28 = arith.constant 0 : index
      %c0_29 = arith.constant 0 : index
      %48 = vector.load %arg15[%c0_28, %c0_29] : memref<128x1xf32, #tpu.memory_space<vmem>>, vector<128x1xf32>
      %49 = arith.mulf %42, %42 : vector<128x128xf32>
      %cst_30 = arith.constant dense<0.000000e+00> : vector<128xf32>
      %50 = vector.multi_reduction <add>, %49, %cst_30 [1] : vector<128x128xf32> to vector<128xf32>
      %51 = vector.shape_cast %50 : vector<128xf32> to vector<128x1xf32>
      %52 = arith.addf %48, %51 : vector<128x1xf32>
      %c0_31 = arith.constant 0 : index
      %c0_32 = arith.constant 0 : index
      %53 = vector.load %arg15[%c0_31, %c0_32] : memref<128x1xf32, #tpu.memory_space<vmem>>, vector<128x1xf32>
      tpu.vector_store %arg15[%c0_31, %c0_32], %52 {strides = array<i32>} : memref<128x1xf32, #tpu.memory_space<vmem>>, vector<128x1xf32>,
    } else {
    }
    %c1_i32_20 = arith.constant 1 : i32
    %30 = arith.cmpi eq, %arg0, %c1_i32_20 : i32
    %31 = arith.extui %30 : i1 to i32
    %c0_i32_21 = arith.constant 0 : i32
    %32 = arith.cmpi ne, %31, %c0_i32_21 : i32
    scf.if %32 {
      %c0_22 = arith.constant 0 : index
      %c0_23 = arith.constant 0 : index
      %33 = vector.load %arg18[%c0_22, %c0_23] : memref<128x1xf32, #tpu.memory_space<vmem>>, vector<128x1xf32>
      %34 = vector.broadcast %33 : vector<128x1xf32> to vector<128x128xf32>
      %35 = arith.mulf %26, %34 : vector<128x128xf32>
      %c0_24 = arith.constant 0 : index
      %c0_25 = arith.constant 0 : index
      %36 = vector.load %arg19[%c0_24, %c0_25] : memref<128x1xf32, #tpu.memory_space<vmem>>, vector<128x1xf32>
      %37 = vector.broadcast %36 : vector<128x1xf32> to vector<128x128xf32>
      %38 = arith.addf %35, %37 : vector<128x128xf32>
      %cst_26 = arith.constant 0.000000e+00 : f32
      %39 = vector.broadcast %cst_26 : f32 to vector<128x128xf32>
      %40 = arith.cmpf ogt, %38, %39 : vector<128x128xf32>
      %cst_27 = arith.constant 2.000000e-01 : f32
      %41 = vector.broadcast %cst_27 : f32 to vector<128x128xf32>
      %42 = arith.mulf %41, %38 : vector<128x128xf32>
      %43 = arith.select %40, %38, %42 : vector<128x128xi1>, vector<128x128xf32>
      %c0_28 = arith.constant 0 : index
      %c0_29 = arith.constant 0 : index
      %44 = vector.load %arg5[%c0_28, %c0_29] : memref<128x1xf32, #tpu.memory_space<vmem>>, vector<128x1xf32>
      %45 = vector.broadcast %44 : vector<128x1xf32> to vector<128x128xf32>
      %46 = arith.mulf %43, %45 : vector<128x128xf32>
      %cst_30 = arith.constant dense<0.000000e+00> : vector<128xf32>
      %47 = vector.multi_reduction <add>, %46, %cst_30 [0] : vector<128x128xf32> to vector<128xf32>
      %48 = vector.shape_cast %47 : vector<128xf32> to vector<1x128xf32>
      %c0_31 = arith.constant 0 : index
      %c0_32 = arith.constant 0 : index
      %49 = vector.load %arg12[%c0_31, %c0_32] : memref<1x1xf32, #tpu.memory_space<vmem>>, vector<1x1xf32>
      %50 = vector.broadcast %49 : vector<1x1xf32> to vector<1x128xf32>
      %51 = arith.addf %48, %50 : vector<1x128xf32>
      %52 = arith.negf %51 : vector<1x128xf32>
      %53 = math.exp %52 : vector<1x128xf32>
      %cst_33 = arith.constant 1.000000e+00 : f32
      %54 = vector.broadcast %cst_33 : f32 to vector<1x128xf32>
      %55 = arith.addf %54, %53 : vector<1x128xf32>
      %56 = arith.divf %54, %55 : vector<1x128xf32>
      %c0_34 = arith.constant 0 : index
      %c0_35 = arith.constant 0 : index
      %57 = vector.load %arg13[%c0_34, %c0_35] : memref<1x128xf32, #tpu.memory_space<vmem>>, vector<1x128xf32>
      tpu.vector_store %arg13[%c0_34, %c0_35], %56 {strides = array<i32>} : memref<1x128xf32, #tpu.memory_space<vmem>>, vector<1x128xf32>,
    } else {
    }
    return
  }
  func.func @transform_0(%arg0: i32, %arg1: i32) -> (i32, i32) {
    %c0_i32 = arith.constant 0 : i32
    %c0_i32_0 = arith.constant 0 : i32
    return %c0_i32, %arg1 : i32, i32
  }
  func.func @transform_1(%arg0: i32, %arg1: i32) -> (i32, i32) {
    %c0_i32 = arith.constant 0 : i32
    %c0_i32_0 = arith.constant 0 : i32
    %c0_i32_1 = arith.constant 0 : i32
    return %c0_i32, %c0_i32_0 : i32, i32
  }
  func.func @transform_2(%arg0: i32, %arg1: i32) -> (i32, i32) {
    %c0_i32 = arith.constant 0 : i32
    %c0_i32_0 = arith.constant 0 : i32
    %c0_i32_1 = arith.constant 0 : i32
    return %c0_i32, %c0_i32_0 : i32, i32
  }
  func.func @transform_3(%arg0: i32, %arg1: i32) -> (i32, i32) {
    %c0_i32 = arith.constant 0 : i32
    %c0_i32_0 = arith.constant 0 : i32
    %c0_i32_1 = arith.constant 0 : i32
    return %c0_i32, %c0_i32_0 : i32, i32
  }
  func.func @transform_4(%arg0: i32, %arg1: i32) -> (i32, i32) {
    %c0_i32 = arith.constant 0 : i32
    %c0_i32_0 = arith.constant 0 : i32
    %c0_i32_1 = arith.constant 0 : i32
    return %c0_i32, %c0_i32_0 : i32, i32
  }
  func.func @transform_5(%arg0: i32, %arg1: i32) -> (i32, i32) {
    %c0_i32 = arith.constant 0 : i32
    %c0_i32_0 = arith.constant 0 : i32
    %c0_i32_1 = arith.constant 0 : i32
    return %c0_i32, %c0_i32_0 : i32, i32
  }
  func.func @transform_6(%arg0: i32, %arg1: i32) -> (i32, i32) {
    %c0_i32 = arith.constant 0 : i32
    %c0_i32_0 = arith.constant 0 : i32
    %c0_i32_1 = arith.constant 0 : i32
    return %c0_i32, %c0_i32_0 : i32, i32
  }
  func.func @transform_7(%arg0: i32, %arg1: i32) -> (i32, i32) {
    %c0_i32 = arith.constant 0 : i32
    %c0_i32_0 = arith.constant 0 : i32
    %c0_i32_1 = arith.constant 0 : i32
    return %c0_i32, %c0_i32_0 : i32, i32
  }
  func.func @transform_8(%arg0: i32, %arg1: i32) -> (i32, i32) {
    %c0_i32 = arith.constant 0 : i32
    %c0_i32_0 = arith.constant 0 : i32
    %c0_i32_1 = arith.constant 0 : i32
    return %c0_i32, %c0_i32_0 : i32, i32
  }
  func.func @transform_9(%arg0: i32, %arg1: i32) -> (i32, i32) {
    %c0_i32 = arith.constant 0 : i32
    %c0_i32_0 = arith.constant 0 : i32
    %c0_i32_1 = arith.constant 0 : i32
    return %c0_i32, %c0_i32_0 : i32, i32
  }
  func.func @transform_10(%arg0: i32, %arg1: i32) -> (i32, i32) {
    %c0_i32 = arith.constant 0 : i32
    %c0_i32_0 = arith.constant 0 : i32
    %c0_i32_1 = arith.constant 0 : i32
    return %c0_i32, %c0_i32_0 : i32, i32
  }
  func.func @transform_11(%arg0: i32, %arg1: i32) -> (i32, i32) {
    %0 = arith.muli %arg1, %arg0 : i32
    %c0_i32 = arith.constant 0 : i32
    %c0_i32_0 = arith.constant 0 : i32
    return %c0_i32, %0 : i32, i32
  }
}

</mosaic_0001>

<bundles_post_ra>
// kernel: discriminator_forward.1
= control target key start
LH: loop header
LB: loop body
LE: loop exit
PB: predicated region body
PF: predicated region fallthrough
CT: control target
= control target key end

     0   :  { %s2787_s19 = smov 0   ;;  %s2789_s20 = smov 0   ;;  %s4479_s0 = inlined_call_operand.vmem [shape: bf16[16,128], index: 0, kind: input, shape index: {}]   ;;  %s4480_s1 = inlined_call_operand.vmem [shape: bf16[128,16], index: 1, kind: input, shape index: {}]   ;;  %s4481_s2 = inlined_call_operand.vmem [shape: bf16[128,128], index: 2, kind: input, shape index: {}]   ;;  %s4482_s3 = inlined_call_operand.vmem [shape: f32[128,1], index: 3, kind: input, shape index: {}]   ;;  %s4483_s4 = inlined_call_operand.vmem [shape: f32[128,1], index: 4, kind: input, shape index: {}]   ;;  %s4484_s5 = inlined_call_operand.vmem [shape: f32[128,1], index: 5, kind: input, shape index: {}]   ;;  %s4485_s6 = inlined_call_operand.vmem [shape: f32[128,1], index: 6, kind: input, shape index: {}]   ;;  %s4486_s7 = inlined_call_operand.vmem [shape: f32[128,1], index: 7, kind: input, shape index: {}]   ;;  %s4487_s8 = inlined_call_operand.vmem [shape: f32[128,1], index: 8, kind: input, shape index: {}]   ;;  %s4488_s9 = inlined_call_operand.vmem [shape: f32[128,1], index: 9, kind: input, shape index: {}]   ;;  %s4489_s10 = inlined_call_operand.<no memory space> [shape: f32[1,1], index: 10, kind: input, shape index: {}]   ;;  %s4490_s11 = inlined_call_operand.vmem [shape: f32[1,128], index: 11, kind: output, shape index: {}]  }
   0x1   :  { %v16_v0 = vstv %s4489_s10  ;;  %s2791_s21 = smov 0  }
   0x2   :  { %17 = vst [vmem:[#allocation8] sm:$0x1] %v16_v0 }
   0x3 LB: > { %s35_s10 = sadd.s32 1, %s2715_s20  ;;  %p2482_p0 = scmp.ge.s32.totalorder %s2719_s21, 1  ;;  %s2719_s21 = sphi %s2791_s21, %s23_s21   ;;  %s2715_s20 = sphi %s2789_s20, %s4556_s20   ;;  %s2711_s19 = sphi %s2787_s19, %s4555_s19  }
   0x4   : > { %p37_p1 = scmp.ge.s32.totalorder %s35_s10, 2  ;;  %p352_p2 = scmp.lt.s32.totalorder %s2719_s21, 3 }
   0x6   : > { %s4558_s10 = smov (%p37_p1, %s35_s10), 0  ;;  %p353_p3 = pnand %p2482_p0, %p352_p2 }
   0x7   : > { %p400_p4 = scmp.eq.s32.totalorder (!%p353_p3), %s2711_s19, 0 }
   0x8   : > { %356 = sbr.rel (%p353_p3) target bundleno = 1105 (0x451), region = 64 }
   0xd   : > { %405 = sbr.rel (!%p400_p4) target bundleno = 96 (0x60), region = 68  ;;  %vm406_vm0 = vcmask (%p400_p4), 7168   ;;  %v439_v1 = vld [vmem:[%s4483_s4] sm:$0xff] (%p400_p4)  ;;  %v2721_v3 = vmov (%p400_p4), 0.0   ;;  %v440_v6 = vld [vmem:[%s4483_s4 + $0x8] sm:$0xff] (%p400_p4)  ;;  %v441_v10 = vld [vmem:[%s4483_s4 + $0x10] sm:$0xff] (%p400_p4) }
   0xe   : > { %v471_v2 = vld [vmem:[%s4484_s5] sm:$0xff] (%p400_p4)  ;;  %407 = vst.msk [vmem:[#allocation2] sm:$0xff] (%p400_p4), %vm406_vm0, %v2721_v3  ;;  %v2816_v4 = vmul.f32 (%p400_p4), 0.125, %v439_v1  ;;  %v472_v7 = vld [vmem:[%s4484_s5 + $0x8] sm:$0xff] (%p400_p4)  ;;  %v2826_v8 = vmul.f32 (%p400_p4), 0.125, %v440_v6  ;;  %v473_v11 = vld [vmem:[%s4484_s5 + $0x10] sm:$0xff] (%p400_p4) }
   0xf   : > { %v487_v5 = vmul.f32 (%p400_p4), 0.125, %v471_v2  ;;  %408 = vst.msk [vmem:[#allocation2 + $0x8] sm:$0xff] (%p400_p4), %vm406_vm0, %v2721_v3  ;;  %v488_v9 = vmul.f32 (%p400_p4), 0.125, %v472_v7  ;;  %v2838_v13 = vmul.f32 (%p400_p4), 0.125, %v441_v10  ;;  %v489_v14 = vmul.f32 (%p400_p4), 0.125, %v473_v11  ;;  %v442_v15 = vld [vmem:[%s4483_s4 + $0x18] sm:$0xff] (%p400_p4) }
  0x10   : > { %409 = vst.msk [vmem:[#allocation2 + $0x10] sm:$0xff] (%p400_p4), %vm406_vm0, %v2721_v3  ;;  %v503_v12 = vmul.f32 (%p400_p4), %v2816_v4, %v2816_v4  ;;  %v474_v16 = vld [vmem:[%s4484_s5 + $0x18] sm:$0xff] (%p400_p4)  ;;  %v504_v17 = vmul.f32 (%p400_p4), %v2826_v8, %v2826_v8  ;;  %v2850_v18 = vmul.f32 (%p400_p4), 0.125, %v442_v15  ;;  %v443_v20 = vld [vmem:[%s4483_s4 + $0x20] sm:$0xff] (%p400_p4)  ;;  %v444_v26 = vld [vmem:[%s4483_s4 + $0x28] sm:$0xff] (%p400_p4) }
  0x11   : > { %410 = vst.msk [vmem:[#allocation2 + $0x18] sm:$0xff] (%p400_p4), %vm406_vm0, %v2721_v3  ;;  %v490_v19 = vmul.f32 (%p400_p4), 0.125, %v474_v16  ;;  %v475_v21 = vld [vmem:[%s4484_s5 + $0x20] sm:$0xff] (%p400_p4)  ;;  %v505_v23 = vmul.f32 (%p400_p4), %v2838_v13, %v2838_v13  ;;  %v2862_v24 = vmul.f32 (%p400_p4), 0.125, %v443_v20  ;;  %v476_v27 = vld [vmem:[%s4484_s5 + $0x28] sm:$0xff] (%p400_p4)  ;;  %v2874_v30 = vmul.f32 (%p400_p4), 0.125, %v444_v26 }
  0x12   : > { %411 = vst.msk [vmem:[#allocation2 + $0x20] sm:$0xff] %vm406_vm0, %v2721_v3  ;;  %v519_v22 = vsub.f32 %v487_v5, %v503_v12  ;;  %v491_v25 = vmul.f32 0.125, %v475_v21  ;;  %v520_v28 = vsub.f32 %v488_v9, %v504_v17  ;;  %v506_v29 = vmul.f32 %v2850_v18, %v2850_v18  ;;  %v445_v32 = vld [vmem:[%s4483_s4 + $0x30] sm:$0xff]  ;;  %v446_v42 = vld [vmem:[%s4483_s4 + $0x38] sm:$0xff]  ;;  %v447_v58 = vld [vmem:[%s4483_s4 + $0x40] sm:$0xff] }
  0x13   : > { %412 = vst.msk [vmem:[#allocation2 + $0x28] sm:$0xff] %vm406_vm0, %v2721_v3  ;;  %v492_v31 = vmul.f32 0.125, %v476_v27  ;;  %v477_v33 = vld [vmem:[%s4484_s5 + $0x30] sm:$0xff]  ;;  %v521_v35 = vsub.f32 %v489_v14, %v505_v23  ;;  %v507_v36 = vmul.f32 %v2862_v24, %v2862_v24  ;;  %v2886_v37 = vmul.f32 0.125, %v445_v32  ;;  %v478_v53 = vld [vmem:[%s4484_s5 + $0x38] sm:$0xff]  ;;  %v479_v63 = vld [vmem:[%s4484_s5 + $0x40] sm:$0xff] }
  0x14   : > { %413 = vst.msk [vmem:[#allocation2 + $0x30] sm:$0xff] %vm406_vm0, %v2721_v3  ;;  %v535_v34 = vmax.f32 %v519_v22, 0.0  ;;  %v536_v38 = vmax.f32 %v520_v28, 0.0  ;;  %v522_v39 = vsub.f32 %v490_v19, %v506_v29  ;;  %v508_v40 = vmul.f32 %v2874_v30, %v2874_v30  ;;  %v448_v0 = vld [vmem:[%s4483_s4 + $0x48] sm:$0xff]  ;;  %v449_v9 = vld [vmem:[%s4483_s4 + $0x50] sm:$0xff] }
  0x15   : > { %414 = vst.msk [vmem:[#allocation2 + $0x38] sm:$0xff] %vm406_vm0, %v2721_v3  ;;  %v493_v41 = vmul.f32 0.125, %v477_v33  ;;  %v537_v44 = vmax.f32 %v521_v35, 0.0  ;;  %v523_v45 = vsub.f32 %v491_v25, %v507_v36  ;;  %v509_v46 = vmul.f32 %v2886_v37, %v2886_v37  ;;  %v480_v1 = vld [vmem:[%s4484_s5 + $0x48] sm:$0xff] }
  0x16   : > { %415 = vst.msk [vmem:[#allocation2 + $0x40] sm:$0xff] %vm406_vm0, %v2721_v3  ;;  %v2897_v43 = vadd.f32 1e-05, %v535_v34  ;;  %v2903_v47 = vadd.f32 1e-05, %v536_v38  ;;  %v538_v48 = vmax.f32 %v522_v39, 0.0  ;;  %v524_v49 = vsub.f32 %v492_v31, %v508_v40 }
  0x17   : > { %416 = vst.msk [vmem:[#allocation2 + $0x48] sm:$0xff] %vm406_vm0, %v2721_v3  ;;  %v2908_v50 = vadd.f32 1e-05, %v537_v44  ;;  %v539_v51 = vmax.f32 %v523_v45, 0.0  ;;  %v2910_v52 = vmul.f32 0.125, %v446_v42  ;;  %v525_v57 = vsub.f32 %v493_v41, %v509_v46  ;;  %v557_v44 = vld [vmem:[%s4485_s6 + $0x30] sm:$0xff] }
  0x18   : > { %417 = vst.msk [vmem:[#allocation2 + $0x50] sm:$0xff] %vm406_vm0, %v2721_v3  ;;  %2623 = vrsqrt.f32 %v2897_v43  ;;  %v2918_v54 = vadd.f32 1e-05, %v538_v48  ;;  %v540_v55 = vmax.f32 %v524_v49, 0.0  ;;  %v494_v60 = vmul.f32 0.125, %v478_v53 }
  0x19   : > { %418 = vst.msk [vmem:[#allocation2 + $0x58] sm:$0xff] %vm406_vm0, %v2721_v3  ;;  %2625 = vrsqrt.f32 %v2903_v47  ;;  %v2923_v56 = vadd.f32 1e-05, %v539_v51  ;;  %v541_v61 = vmax.f32 %v525_v57, 0.0  ;;  %v510_v62 = vmul.f32 %v2910_v52, %v2910_v52 }
  0x1a   : > { %419 = vst.msk [vmem:[#allocation2 + $0x60] sm:$0xff] %vm406_vm0, %v2721_v3  ;;  %2627 = vrsqrt.f32 %v2908_v50  ;;  %v2931_v59 = vadd.f32 1e-05, %v540_v55  ;;  %vm589_vm1 = vweird.f32 %v2897_v43  ;;  %vm599_vm2 = vweird.f32 %v2903_v47 }
  0x1b   : > { %420 = vst.msk [vmem:[#allocation2 + $0x68] sm:$0xff] %vm406_vm0, %v2721_v3  ;;  %2629 = vrsqrt.f32 %v2918_v54  ;;  %v2952_v2 = vmul.f32 0.125, %v447_v58  ;;  %vm609_vm3 = vweird.f32 %v2908_v50  ;;  %vm619_vm4 = vweird.f32 %v2918_v54 }
  0x1c   : > { %421 = vst.msk [vmem:[#allocation2 + $0x70] sm:$0xff] %vm406_vm0, %v2721_v3  ;;  %2631 = vrsqrt.f32 %v2923_v56  ;;  %v2960_v6 = vadd.f32 1e-05, %v541_v61  ;;  %v526_v7 = vsub.f32 %v494_v60, %v510_v62  ;;  %vm629_vm5 = vweird.f32 %v2923_v56  ;;  %v551_v62 = vld [vmem:[%s4485_s6] sm:$0xff] }
  0x1d   : > { %422 = vst.msk [vmem:[#allocation2 + $0x78] sm:$0xff] %vm406_vm0, %v2721_v3  ;;  %2633 = vrsqrt.f32 %v2931_v59  ;;  %v2972_v12 = vmul.f32 0.125, %v479_v63  ;;  %v2974_v14 = vmul.f32 0.125, %v448_v0  ;;  %v2976_v15 = vmul.f32 0.125, %v480_v1 }
  0x1e   : > { %v2954_v5 = vpop.eup %2623  ;;  %423 = vst.msk [vmem:[#allocation3] sm:$0xff] %vm406_vm0, %v2721_v3  ;;  %vm639_vm7 = vweird.f32 %v2931_v59  ;;  %2635 = vrsqrt.f32 %v2960_v6  ;;  %v2989_v19 = vmul.f32 %v2952_v2, %v2952_v2  ;;  %v2999_v23 = vmul.f32 0.125, %v449_v9 }
  0x1f   : > { %v2965_v10 = vpop.eup %2625  ;;  %424 = vst.msk [vmem:[#allocation3 + $0x8] sm:$0xff] %vm406_vm0, %v2721_v3  ;;  %v584_v11 = vmul.f32 %v2954_v5, %v2897_v43  ;;  %vm590_vm6 = vweird.f32 %v2954_v5  ;;  %v542_v28 = vmax.f32 %v526_v7, 0.0  ;;  %vm649_vm11 = vweird.f32 %v2960_v6 }
  0x20   : > { %v2978_v16 = vpop.eup %2627  ;;  %425 = vst.msk [vmem:[#allocation3 + $0x10] sm:$0xff] %vm406_vm0, %v2721_v3  ;;  %v594_v17 = vmul.f32 %v2965_v10, %v2903_v47  ;;  %vm600_vm8 = vweird.f32 %v2965_v10  ;;  %v527_v38 = vsub.f32 %v2972_v12, %v2989_v19  ;;  %vm3037_vm13 = vmor %vm589_vm1, %vm590_vm6 }
  0x21   : > { %v2991_v20 = vpop.eup %2629  ;;  %426 = vst.msk [vmem:[#allocation3 + $0x18] sm:$0xff] %vm406_vm0, %v2721_v3  ;;  %v585_v21 = vmul.f32 %v2954_v5, %v584_v11  ;;  %v604_v22 = vmul.f32 %v2978_v16, %v2908_v50  ;;  %vm610_vm9 = vweird.f32 %v2978_v16  ;;  %vm3050_vm15 = vmor %vm599_vm2, %vm600_vm8  ;;  %v3067_v61 = vadd.f32 1e-05, %v542_v28 }
  0x22   : > { %v3001_v25 = vpop.eup %2631  ;;  %427 = vst.msk [vmem:[#allocation3 + $0x20] sm:$0xff] %vm406_vm0, %v2721_v3  ;;  %v595_v26 = vmul.f32 %v2965_v10, %v594_v17  ;;  %v614_v27 = vmul.f32 %v2991_v20, %v2918_v54  ;;  %vm620_vm10 = vweird.f32 %v2991_v20  ;;  %vm3063_vm1 = vmor %vm609_vm3, %vm610_vm9  ;;  %v553_v54 = vld [vmem:[%s4485_s6 + $0x10] sm:$0xff]  ;;  %v543_v19 = vmax.f32 %v527_v38, 0.0 }
  0x23   : > { %v3009_v29 = vpop.eup %2633  ;;  %428 = vst.msk [vmem:[#allocation3 + $0x28] sm:$0xff] %vm406_vm0, %v2721_v3  ;;  %v586_v31 = vmul.f32 0.5, %v585_v21  ;;  %v605_v32 = vmul.f32 %v2978_v16, %v604_v22  ;;  %v624_v33 = vmul.f32 %v3001_v25, %v2923_v56  ;;  %vm630_vm12 = vweird.f32 %v3001_v25  ;;  %vm3082_vm2 = vmor %vm619_vm4, %vm620_vm10  ;;  %v554_v21 = vld [vmem:[%s4485_s6 + $0x18] sm:$0xff] }
  0x24   : > { %429 = vst.msk [vmem:[#allocation3 + $0x30] sm:$0xff] %vm406_vm0, %v2721_v3  ;;  %v596_v34 = vmul.f32 0.5, %v595_v26  ;;  %v615_v35 = vmul.f32 %v2991_v20, %v614_v27  ;;  %v634_v36 = vmul.f32 %v3009_v29, %v2931_v59  ;;  %v3029_v42 = vpop.eup %2635  ;;  %vm640_vm14 = vweird.f32 %v3009_v29  ;;  %vm3103_vm3 = vmor %vm629_vm5, %vm630_vm12  ;;  %v555_v59 = vld [vmem:[%s4485_s6 + $0x20] sm:$0xff] }
  0x25   : > { %430 = vst.msk [vmem:[#allocation3 + $0x38] sm:$0xff] %vm406_vm0, %v2721_v3  ;;  %v587_v39 = vsub.f32 1.5, %v586_v31  ;;  %v606_v40 = vmul.f32 0.5, %v605_v32  ;;  %v625_v41 = vmul.f32 %v3001_v25, %v624_v33  ;;  %v644_v55 = vmul.f32 %v3029_v42, %v2960_v6  ;;  %vm3120_vm4 = vmor %vm639_vm7, %vm640_vm14  ;;  %v481_v31 = vld [vmem:[%s4484_s5 + $0x50] sm:$0xff] }
  0x26   : > { %431 = vst.msk [vmem:[#allocation3 + $0x40] sm:$0xff] %vm406_vm0, %v2721_v3  ;;  %v597_v45 = vsub.f32 1.5, %v596_v34  ;;  %v616_v46 = vmul.f32 0.5, %v615_v35  ;;  %v635_v48 = vmul.f32 %v3009_v29, %v634_v36  ;;  %vm650_vm5 = vweird.f32 %v3029_v42  ;;  %v556_v34 = vld [vmem:[%s4485_s6 + $0x28] sm:$0xff]  ;;  %v450_v36 = vld [vmem:[%s4483_s4 + $0x58] sm:$0xff] }
  0x27   : > { %432 = vst.msk [vmem:[#allocation3 + $0x48] sm:$0xff] %vm406_vm0, %v2721_v3  ;;  %v588_v49 = vmul.f32 %v2954_v5, %v587_v39  ;;  %v607_v51 = vsub.f32 1.5, %v606_v40  ;;  %v626_v53 = vmul.f32 0.5, %v625_v41  ;;  %v645_v7 = vmul.f32 %v3029_v42, %v644_v55  ;;  %vm3166_vm6 = vmor %vm649_vm11, %vm650_vm5  ;;  %v482_v41 = vld [vmem:[%s4484_s5 + $0x58] sm:$0xff] }
  0x28   : > { %433 = vst.msk [vmem:[#allocation3 + $0x50] sm:$0xff] %vm406_vm0, %v2721_v3  ;;  %v598_v57 = vmul.f32 %v2965_v10, %v597_v45  ;;  %v617_v58 = vsub.f32 1.5, %v616_v46  ;;  %v636_v60 = vmul.f32 0.5, %v635_v48  ;;  %2637 = vrsqrt.f32 %v3067_v61 }
  0x29   : > { %434 = vst.msk [vmem:[#allocation3 + $0x58] sm:$0xff] %vm406_vm0, %v2721_v3  ;;  %v592_v63 = vsel %vm3037_vm13, %v2954_v5, %v588_v49  ;;  %v608_v50 = vmul.f32 %v2978_v16, %v607_v51  ;;  %v627_v1 = vsub.f32 1.5, %v626_v53  ;;  %v552_v5 = vld [vmem:[%s4485_s6 + $0x8] sm:$0xff]  ;;  %v646_v26 = vmul.f32 0.5, %v645_v7  ;;  %v483_v49 = vld [vmem:[%s4484_s5 + $0x60] sm:$0xff] }
  0x2a   : > { %435 = vst.msk [vmem:[#allocation3 + $0x60] sm:$0xff] %vm406_vm0, %v2721_v3  ;;  %v602_v9 = vsel %vm3050_vm15, %v2965_v10, %v598_v57  ;;  %v618_v11 = vmul.f32 %v2991_v20, %v617_v58  ;;  %v637_v17 = vsub.f32 1.5, %v636_v60  ;;  %v3170_v39 = vadd.f32 1e-05, %v543_v19  ;;  %v452_v60 = vld [vmem:[%s4483_s4 + $0x68] sm:$0xff] }
  0x2b   : > { %436 = vst.msk [vmem:[#allocation3 + $0x68] sm:$0xff] %vm406_vm0, %v2721_v3  ;;  %v612_v10 = vsel %vm3063_vm1, %v2978_v16, %v608_v50  ;;  %v628_v22 = vmul.f32 %v3001_v25, %v627_v1  ;;  %v3127_v16 = vmul.f32 %v592_v63, %v551_v62  ;;  %v3142_v32 = vmul.f32 %v602_v9, %v552_v5  ;;  %v453_v1 = vld [vmem:[%s4483_s4 + $0x70] sm:$0xff] }
  0x2c   : > { %437 = vst.msk [vmem:[#allocation3 + $0x70] sm:$0xff] %vm406_vm0, %v2721_v3  ;;  %v622_v27 = vsel %vm3082_vm2, %v2991_v20, %v618_v11  ;;  %v638_v28 = vmul.f32 %v3009_v29, %v637_v17  ;;  %v3144_v33 = vmul.f32 %v612_v10, %v553_v54  ;;  %v647_v35 = vsub.f32 1.5, %v646_v26 }
  0x2d   : > { %438 = vst.msk [vmem:[#allocation3 + $0x78] sm:$0xff] %vm406_vm0, %v2721_v3  ;;  %v632_v20 = vsel %vm3103_vm3, %v3001_v25, %v628_v22  ;;  %v3157_v3 = vmul.f32 %v622_v27, %v554_v21  ;;  %v512_v40 = vmul.f32 %v2974_v14, %v2974_v14  ;;  %v497_v46 = vmul.f32 0.125, %v481_v31 }
  0x2e   : > { %759 = vst.msk [vmem:[#allocation4] sm:$0xff] %vm406_vm0, %v3127_v16  ;;  %v642_v38 = vsel %vm3120_vm4, %v3009_v29, %v638_v28  ;;  %v451_v29 = vld [vmem:[%s4483_s4 + $0x60] sm:$0xff]  ;;  %v3182_v6 = vmul.f32 %v632_v20, %v555_v59  ;;  %v648_v45 = vmul.f32 %v3029_v42, %v647_v35  ;;  %v513_v48 = vmul.f32 %v2999_v23, %v2999_v23  ;;  %v2638_v62 = vpop.eup %2637  ;;  %v485_v59 = vld [vmem:[%s4484_s5 + $0x70] sm:$0xff] }
  0x2f   : > { %760 = vst.msk [vmem:[#allocation4 + $0x8] sm:$0xff] %vm406_vm0, %v3142_v32  ;;  %v3195_v43 = vmul.f32 %v642_v38, %v556_v34  ;;  %2639 = vrsqrt.f32 %v3170_v39  ;;  %v528_v51 = vsub.f32 %v2976_v15, %v512_v40  ;;  %v3199_v53 = vmul.f32 0.125, %v450_v36  ;;  %v484_v15 = vld [vmem:[%s4484_s5 + $0x68] sm:$0xff] }
  0x30   : > { %761 = vst.msk [vmem:[#allocation4 + $0x10] sm:$0xff] %vm406_vm0, %v3144_v33  ;;  %v652_v55 = vsel %vm3166_vm6, %v3029_v42, %v648_v45  ;;  %v529_v57 = vsub.f32 %v497_v46, %v513_v48  ;;  %v498_v47 = vmul.f32 0.125, %v482_v41  ;;  %v3206_v58 = vmul.f32 0.125, %v451_v29  ;;  %v454_v41 = vld [vmem:[%s4483_s4 + $0x78] sm:$0xff] }
  0x31   : > { %762 = vst.msk [vmem:[#allocation4 + $0x18] sm:$0xff] %vm406_vm0, %v3157_v3  ;;  %v3216_v63 = vmul.f32 %v652_v55, %v557_v44  ;;  %v544_v50 = vmax.f32 %v528_v51, 0.0  ;;  %v514_v42 = vmul.f32 %v3199_v53, %v3199_v53  ;;  %v499_v0 = vmul.f32 0.125, %v483_v49  ;;  %v558_v46 = vld [vmem:[%s4485_s6 + $0x38] sm:$0xff] }
  0x32   : > { %763 = vst.msk [vmem:[#allocation4 + $0x20] sm:$0xff] %vm406_vm0, %v3182_v6  ;;  %v654_v7 = vmul.f32 %v2638_v62, %v3067_v61  ;;  %v545_v5 = vmax.f32 %v529_v57, 0.0  ;;  %v515_v9 = vmul.f32 %v3206_v58, %v3206_v58  ;;  %v3232_v12 = vmul.f32 0.125, %v452_v60  ;;  %v486_v51 = vld [vmem:[%s4484_s5 + $0x78] sm:$0xff] }
  0x33   : > { %764 = vst.msk [vmem:[#allocation4 + $0x28] sm:$0xff] %vm406_vm0, %v3195_v43  ;;  %v3230_v54 = vadd.f32 1e-05, %v544_v50  ;;  %v530_v11 = vsub.f32 %v498_v47, %v514_v42  ;;  %v500_v17 = vmul.f32 0.125, %v484_v15  ;;  %v3236_v22 = vmul.f32 0.125, %v453_v1 }
  0x34   : > { %765 = vst.msk [vmem:[#allocation4 + $0x30] sm:$0xff] %vm406_vm0, %v3216_v63  ;;  %v655_v19 = vmul.f32 %v2638_v62, %v654_v7  ;;  %v3234_v10 = vadd.f32 1e-05, %v545_v5  ;;  %v531_v21 = vsub.f32 %v499_v0, %v515_v9  ;;  %vm659_vm7 = vweird.f32 %v3067_v61  ;;  %v559_v5 = vld [vmem:[%s4485_s6 + $0x40] sm:$0xff] }
  0x35   : > { %v3238_v56 = vpop.eup %2639  ;;  %2641 = vrsqrt.f32 %v3230_v54  ;;  %v546_v26 = vmax.f32 %v530_v11, 0.0  ;;  %v516_v27 = vmul.f32 %v3232_v12, %v3232_v12  ;;  %vm660_vm8 = vweird.f32 %v2638_v62 }
  0x36   : > { %v656_v28 = vmul.f32 0.5, %v655_v19  ;;  %v664_v31 = vmul.f32 %v3238_v56, %v3170_v39  ;;  %2643 = vrsqrt.f32 %v3234_v10  ;;  %vm669_vm9 = vweird.f32 %v3170_v39  ;;  %vm3261_vm10 = vmor %vm659_vm7, %vm660_vm8 }
  0x37   : > { %v3251_v20 = vadd.f32 1e-05, %v546_v26  ;;  %v547_v34 = vmax.f32 %v531_v21, 0.0  ;;  %v532_v35 = vsub.f32 %v500_v17, %v516_v27  ;;  %v501_v25 = vmul.f32 0.125, %v485_v59 }
  0x38   : > { %v657_v36 = vsub.f32 1.5, %v656_v28  ;;  %v665_v38 = vmul.f32 %v3238_v56, %v664_v31  ;;  %v517_v40 = vmul.f32 %v3236_v22, %v3236_v22  ;;  %vm679_vm11 = vweird.f32 %v3230_v54 }
  0x39   : > { %2645 = vrsqrt.f32 %v3251_v20  ;;  %v3267_v44 = vadd.f32 1e-05, %v547_v34  ;;  %v548_v45 = vmax.f32 %v532_v35, 0.0  ;;  %vm670_vm12 = vweird.f32 %v3238_v56 }
  0x3a   : > { %v658_v48 = vmul.f32 %v2638_v62, %v657_v36  ;;  %v666_v49 = vmul.f32 0.5, %v665_v38  ;;  %v533_v61 = vsub.f32 %v501_v25, %v517_v40  ;;  %vm689_vm13 = vweird.f32 %v3234_v10  ;;  %vm3295_vm15 = vmor %vm669_vm9, %vm670_vm12 }
  0x3b   : > { %v3276_v55 = vpop.eup %2641  ;;  %2647 = vrsqrt.f32 %v3267_v44  ;;  %v3280_v57 = vadd.f32 1e-05, %v548_v45  ;;  %v3282_v47 = vmul.f32 0.125, %v454_v41  ;;  %vm699_vm14 = vweird.f32 %v3251_v20  ;;  %v775_v41 = vld [vmem:[%s4486_s7] sm:$0xff] }
  0x3c   : > { %v3284_v60 = vpop.eup %2643  ;;  %v662_v15 = vsel %vm3261_vm10, %v2638_v62, %v658_v48  ;;  %v667_v50 = vsub.f32 1.5, %v666_v49  ;;  %v674_v42 = vmul.f32 %v3276_v55, %v3230_v54  ;;  %v502_v62 = vmul.f32 0.125, %v486_v51  ;;  %v561_v51 = vld [vmem:[%s4485_s6 + $0x50] sm:$0xff] }
  0x3d   : > { %v3291_v0 = vmul.f32 %v662_v15, %v558_v46  ;;  %v684_v7 = vmul.f32 %v3284_v60, %v3234_v10  ;;  %2649 = vrsqrt.f32 %v3280_v57  ;;  %vm709_vm1 = vweird.f32 %v3267_v44 }
  0x3e   : > { %v668_v9 = vmul.f32 %v3238_v56, %v667_v50  ;;  %v675_v11 = vmul.f32 %v3276_v55, %v674_v42  ;;  %v549_v39 = vmax.f32 %v533_v61, 0.0  ;;  %vm680_vm2 = vweird.f32 %v3276_v55 }
  0x3f   : > { %v3308_v17 = vpop.eup %2645  ;;  %766 = vst.msk [vmem:[#allocation4 + $0x38] sm:$0xff] %vm406_vm0, %v3291_v0  ;;  %v685_v19 = vmul.f32 %v3284_v60, %v684_v7  ;;  %vm690_vm3 = vweird.f32 %v3284_v60  ;;  %v518_v21 = vmul.f32 %v3282_v47, %v3282_v47  ;;  %vm719_vm4 = vweird.f32 %v3280_v57  ;;  %vm3347_vm5 = vmor %vm679_vm11, %vm680_vm2 }
  0x40   : > { %v672_v26 = vsel %vm3295_vm15, %v3238_v56, %v668_v9  ;;  %v676_v27 = vmul.f32 0.5, %v675_v11  ;;  %v694_v59 = vmul.f32 %v3308_v17, %v3251_v20  ;;  %v791_v28 = vmul.f32 %v3127_v16, %v2816_v4  ;;  %vm3361_vm7 = vmor %vm689_vm13, %vm690_vm3  ;;  %v777_v20 = vld [vmem:[%s4486_s7 + $0x10] sm:$0xff] }
  0x41   : > { %v3325_v31 = vpop.eup %2647  ;;  %v3327_v34 = vmul.f32 %v672_v26, %v559_v5  ;;  %v686_v35 = vmul.f32 0.5, %v685_v19  ;;  %v3329_v36 = vadd.f32 1e-05, %v549_v39  ;;  %v534_v38 = vsub.f32 %v502_v62, %v518_v21  ;;  %v776_v5 = vld [vmem:[%s4486_s7 + $0x8] sm:$0xff]  ;;  %v562_v19 = vld [vmem:[%s4485_s6 + $0x58] sm:$0xff] }
  0x42   : > { %v677_v25 = vsub.f32 1.5, %v676_v27  ;;  %v695_v56 = vmul.f32 %v3308_v17, %v694_v59  ;;  %v704_v40 = vmul.f32 %v3325_v31, %v3267_v44  ;;  %v792_v4 = vmul.f32 %v3142_v32, %v2826_v8  ;;  %v560_v8 = vld [vmem:[%s4485_s6 + $0x48] sm:$0xff] }
  0x43   : > { %v3339_v16 = vpop.eup %2649  ;;  %767 = vst.msk [vmem:[#allocation4 + $0x40] sm:$0xff] %vm406_vm0, %v3327_v34  ;;  %v687_v45 = vsub.f32 1.5, %v686_v35  ;;  %vm700_vm6 = vweird.f32 %v3308_v17  ;;  %2651 = vrsqrt.f32 %v3329_v36  ;;  %v550_v46 = vmax.f32 %v534_v38, 0.0  ;;  %v778_v38 = vld [vmem:[%s4486_s7 + $0x18] sm:$0xff] }
  0x44   : > { %v678_v32 = vmul.f32 %v3276_v55, %v677_v25  ;;  %v696_v48 = vmul.f32 0.5, %v695_v56  ;;  %v705_v49 = vmul.f32 %v3325_v31, %v704_v40  ;;  %v714_v61 = vmul.f32 %v3339_v16, %v3280_v57  ;;  %vm3389_vm9 = vmor %vm699_vm14, %vm700_vm6  ;;  %v564_v57 = vld [vmem:[%s4485_s6 + $0x68] sm:$0xff] }
  0x45   : > { %v688_v15 = vmul.f32 %v3284_v60, %v687_v45  ;;  %vm710_vm8 = vweird.f32 %v3325_v31  ;;  %v3373_v50 = vadd.f32 1e-05, %v550_v46  ;;  %v807_v10 = vsub.f32 %v775_v41, %v791_v28  ;;  %v780_v46 = vld [vmem:[%s4486_s7 + $0x28] sm:$0xff] }
  0x46   : > { %v682_v42 = vsel %vm3347_vm5, %v3276_v55, %v678_v32  ;;  %v697_v1 = vsub.f32 1.5, %v696_v48  ;;  %v706_v7 = vmul.f32 0.5, %v705_v49  ;;  %v715_v62 = vmul.f32 %v3339_v16, %v714_v61  ;;  %vm3410_vm11 = vmor %vm709_vm1, %vm710_vm8 }
  0x47   : > { %v752_v9 = vmul.f32 %v682_v42, %v560_v8  ;;  %v692_v11 = vsel %vm3361_vm7, %v3284_v60, %v688_v15  ;;  %vm720_vm10 = vweird.f32 %v3339_v16  ;;  %2653 = vrsqrt.f32 %v3373_v50  ;;  %823 = vst.msk [vmem:[#allocation5] sm:$0xff] %vm406_vm0, %v807_v10  ;;  %v781_v8 = vld [vmem:[%s4486_s7 + $0x30] sm:$0xff] }
  0x48   : > { %v753_v55 = vmul.f32 %v692_v11, %v561_v51  ;;  %v698_v60 = vmul.f32 %v3308_v17, %v697_v1  ;;  %v707_v21 = vsub.f32 1.5, %v706_v7  ;;  %v716_v26 = vmul.f32 0.5, %v715_v62  ;;  %vm3437_vm12 = vmor %vm719_vm4, %vm720_vm10  ;;  %v785_v11 = vld [vmem:[%s4486_s7 + $0x50] sm:$0xff] }
  0x49   : > { %v3403_v27 = vpop.eup %2651  ;;  %768 = vst.msk [vmem:[#allocation4 + $0x48] sm:$0xff] %vm406_vm0, %v752_v9  ;;  %v808_v28 = vsub.f32 %v776_v5, %v792_v4  ;;  %v793_v35 = vmul.f32 %v3144_v33, %v2838_v13  ;;  %v794_v25 = vmul.f32 %v3157_v3, %v2850_v18  ;;  %v795_v56 = vmul.f32 %v3182_v6, %v2862_v24  ;;  %v563_v13 = vld [vmem:[%s4485_s6 + $0x60] sm:$0xff] }
  0x4a   : > { %769 = vst.msk [vmem:[#allocation4 + $0x50] sm:$0xff] %vm406_vm0, %v753_v55  ;;  %v702_v44 = vsel %vm3389_vm9, %v3308_v17, %v698_v60  ;;  %v708_v33 = vmul.f32 %v3325_v31, %v707_v21  ;;  %v717_v40 = vsub.f32 1.5, %v716_v26  ;;  %v724_v41 = vmul.f32 %v3403_v27, %v3329_v36  ;;  %v779_v6 = vld [vmem:[%s4486_s7 + $0x20] sm:$0xff] }
  0x4b   : > { %v754_v18 = vmul.f32 %v702_v44, %v562_v19  ;;  %vm729_vm13 = vweird.f32 %v3329_v36  ;;  %vm730_vm14 = vweird.f32 %v3403_v27  ;;  %824 = vst.msk [vmem:[#allocation5 + $0x8] sm:$0xff] %vm406_vm0, %v808_v28  ;;  %v809_v3 = vsub.f32 %v777_v20, %v793_v35  ;;  %v788_v35 = vld [vmem:[%s4486_s7 + $0x68] sm:$0xff] }
  0x4c   : > { %v712_v17 = vsel %vm3410_vm11, %v3325_v31, %v708_v33  ;;  %v718_v4 = vmul.f32 %v3339_v16, %v717_v40  ;;  %v725_v29 = vmul.f32 %v3403_v27, %v724_v41  ;;  %v810_v45 = vsub.f32 %v778_v38, %v794_v25  ;;  %vm3489_vm15 = vmor %vm729_vm13, %vm730_vm14  ;;  %v789_v38 = vld [vmem:[%s4486_s7 + $0x70] sm:$0xff]  ;;  %v790_v40 = vld [vmem:[%s4486_s7 + $0x78] sm:$0xff] }
  0x4d   : > { %v2654_v32 = vpop.eup %2653  ;;  %770 = vst.msk [vmem:[#allocation4 + $0x58] sm:$0xff] %vm406_vm0, %v754_v18  ;;  %v755_v31 = vmul.f32 %v712_v17, %v563_v13  ;;  %v796_v54 = vmul.f32 %v3195_v43, %v2874_v30  ;;  %v797_v48 = vmul.f32 %v3216_v63, %v2886_v37  ;;  %v798_v49 = vmul.f32 %v3291_v0, %v2910_v52  ;;  %v782_v30 = vld [vmem:[%s4486_s7 + $0x38] sm:$0xff]  ;;  %v783_v52 = vld [vmem:[%s4486_s7 + $0x40] sm:$0xff] }
  0x4e   : > { %v722_v61 = vsel %vm3437_vm12, %v3339_v16, %v718_v4  ;;  %v726_v51 = vmul.f32 0.5, %v725_v29  ;;  %v734_v15 = vmul.f32 %v2654_v32, %v3373_v50  ;;  %825 = vst.msk [vmem:[#allocation5 + $0x10] sm:$0xff] %vm406_vm0, %v809_v3  ;;  %v811_v10 = vsub.f32 %v779_v6, %v795_v56 }
  0x4f   : > { %771 = vst.msk [vmem:[#allocation4 + $0x60] sm:$0xff] %vm406_vm0, %v755_v31  ;;  %v756_v37 = vmul.f32 %v722_v61, %v564_v57  ;;  %v812_v43 = vsub.f32 %v780_v46, %v796_v54  ;;  %v813_v63 = vsub.f32 %v781_v8, %v797_v48  ;;  %v799_v42 = vmul.f32 %v3327_v34, %v2952_v2  ;;  %v784_v2 = vld [vmem:[%s4486_s7 + $0x48] sm:$0xff]  ;;  %v565_v34 = vld [vmem:[%s4485_s6 + $0x70] sm:$0xff] }
  0x50   : > { %v727_v0 = vsub.f32 1.5, %v726_v51  ;;  %v735_v16 = vmul.f32 %v2654_v32, %v734_v15  ;;  %826 = vst.msk [vmem:[#allocation5 + $0x18] sm:$0xff] %vm406_vm0, %v810_v45  ;;  %v800_v1 = vmul.f32 %v752_v9, %v2974_v14  ;;  %vm739_vm1 = vweird.f32 %v3373_v50 }
  0x51   : > { %772 = vst.msk [vmem:[#allocation4 + $0x68] sm:$0xff] %vm406_vm0, %v756_v37  ;;  %vm740_vm2 = vweird.f32 %v2654_v32  ;;  %v814_v62 = vsub.f32 %v782_v30, %v798_v49  ;;  %v801_v14 = vmul.f32 %v753_v55, %v2999_v23  ;;  %v815_v9 = vsub.f32 %v783_v52, %v799_v42  ;;  %v786_v23 = vld [vmem:[%s4486_s7 + $0x58] sm:$0xff] }
  0x52   : > { %v728_v36 = vmul.f32 %v3403_v27, %v727_v0  ;;  %v736_v5 = vmul.f32 0.5, %v735_v16  ;;  %827 = vst.msk [vmem:[#allocation5 + $0x20] sm:$0xff] %vm406_vm0, %v811_v10  ;;  %v802_v39 = vmul.f32 %v754_v18, %v3199_v53  ;;  %v816_v60 = vsub.f32 %v784_v2, %v800_v1  ;;  %vm3519_vm3 = vmor %vm739_vm1, %vm740_vm2 }
  0x53   : > { %828 = vst.msk [vmem:[#allocation5 + $0x28] sm:$0xff] %vm406_vm0, %v812_v43  ;;  %v803_v21 = vmul.f32 %v755_v31, %v3206_v58  ;;  %v817_v20 = vsub.f32 %v785_v11, %v801_v14  ;;  %v804_v59 = vmul.f32 %v756_v37, %v3232_v12  ;;  %v566_v58 = vld [vmem:[%s4485_s6 + $0x78] sm:$0xff] }
  0x54   : > { %v732_v55 = vsel %vm3489_vm15, %v3403_v27, %v728_v36  ;;  %v737_v19 = vsub.f32 1.5, %v736_v5  ;;  %829 = vst.msk [vmem:[#allocation5 + $0x30] sm:$0xff] %vm406_vm0, %v813_v63  ;;  %v787_v27 = vld [vmem:[%s4486_s7 + $0x60] sm:$0xff]  ;;  %v818_v50 = vsub.f32 %v786_v23, %v802_v39 }
  0x55   : > { %v757_v26 = vmul.f32 %v732_v55, %v565_v34  ;;  %830 = vst.msk [vmem:[#allocation5 + $0x38] sm:$0xff] %vm406_vm0, %v814_v62  ;;  %v819_v56 = vsub.f32 %v787_v27, %v803_v21  ;;  %v820_v13 = vsub.f32 %v788_v35, %v804_v59 }
  0x56   : > { %v738_v28 = vmul.f32 %v2654_v32, %v737_v19  ;;  %831 = vst.msk [vmem:[#allocation5 + $0x40] sm:$0xff] %vm406_vm0, %v815_v9 }
  0x57   : > { %773 = vst.msk [vmem:[#allocation4 + $0x70] sm:$0xff] %vm406_vm0, %v757_v26  ;;  %v805_v12 = vmul.f32 %v757_v26, %v3236_v22 }
  0x58   : > { %v742_v25 = vsel %vm3519_vm3, %v2654_v32, %v738_v28  ;;  %832 = vst.msk [vmem:[#allocation5 + $0x48] sm:$0xff] %vm406_vm0, %v816_v60 }
  0x59   : > { %v758_v44 = vmul.f32 %v742_v25, %v566_v58  ;;  %833 = vst.msk [vmem:[#allocation5 + $0x50] sm:$0xff] %vm406_vm0, %v817_v20  ;;  %v821_v33 = vsub.f32 %v789_v38, %v805_v12 }
  0x5a   : > { %834 = vst.msk [vmem:[#allocation5 + $0x58] sm:$0xff] %vm406_vm0, %v818_v50 }
  0x5b   : > { %774 = vst.msk [vmem:[#allocation4 + $0x78] sm:$0xff] %vm406_vm0, %v758_v44  ;;  %v806_v22 = vmul.f32 %v758_v44, %v3282_v47 }
  0x5c   : > { %835 = vst.msk [vmem:[#allocation5 + $0x60] sm:$0xff] %vm406_vm0, %v819_v56 }
  0x5d   : > { %836 = vst.msk [vmem:[#allocation5 + $0x68] sm:$0xff] %vm406_vm0, %v820_v13  ;;  %v822_v41 = vsub.f32 %v790_v40, %v806_v22 }
  0x5e   : > { %837 = vst.msk [vmem:[#allocation5 + $0x70] sm:$0xff] %vm406_vm0, %v821_v33 }
  0x5f   : > { %838 = vst.msk [vmem:[#allocation5 + $0x78] sm:$0xff] %vm406_vm0, %v822_v41 }
  0x60 PF: > { %p839_p5 = scmp.eq.s32.totalorder %s2711_s19, 1 }
  0x61   : > { %v876_v24 = vld [vmem:[#allocation3] sm:$0xff] (%p839_p5)  ;;  %v877_v47 = vld [vmem:[#allocation3 + $0x8] sm:$0xff] (%p839_p5)  ;;  %v878_v45 = vld [vmem:[#allocation3 + $0x10] sm:$0xff] (%p839_p5)  ;;  %vm1164_vm11 = vcmask (%p839_p5), 7168  }
  0x62   : > { %843 = sbr.rel (!%p839_p5) target bundleno = 182 (0xb6), region = 72  ;;  %v892_v6 = vmul.f32 (%p839_p5), 0.125, %v876_v24  ;;  %v893_v4 = vmul.f32 (%p839_p5), 0.125, %v877_v47  ;;  %v894_v32 = vmul.f32 (%p839_p5), 0.125, %v878_v45  ;;  %v879_v54 = vld [vmem:[#allocation3 + $0x18] sm:$0xff] (%p839_p5)  ;;  %v880_v15 = vld [vmem:[#allocation3 + $0x20] sm:$0xff] (%p839_p5) }
  0x63   : > { %v844_v18 = vld [vmem:[#allocation2] sm:$0xff] (%p839_p5)  ;;  %v895_v61 = vmul.f32 (%p839_p5), 0.125, %v879_v54  ;;  %v896_v43 = vmul.f32 (%p839_p5), 0.125, %v880_v15  ;;  %v849_v63 = vld [vmem:[#allocation2 + $0x28] sm:$0xff] (%p839_p5)  ;;  %v850_v7 = vld [vmem:[#allocation2 + $0x30] sm:$0xff] (%p839_p5) }
  0x64   : > { %v3555_v3 = vmul.f32 (%p839_p5), 0.125, %v844_v18  ;;  %v845_v17 = vld [vmem:[#allocation2 + $0x8] sm:$0xff] (%p839_p5)  ;;  %v3573_v42 = vmul.f32 (%p839_p5), 0.125, %v849_v63  ;;  %v882_v62 = vld [vmem:[#allocation3 + $0x30] sm:$0xff] (%p839_p5)  ;;  %v3577_v36 = vmul.f32 (%p839_p5), 0.125, %v850_v7  ;;  %v851_v23 = vld [vmem:[#allocation2 + $0x38] sm:$0xff] (%p839_p5) }
  0x65   : > { %v3557_v57 = vmul.f32 (%p839_p5), 0.125, %v845_v17  ;;  %v846_v29 = vld [vmem:[#allocation2 + $0x10] sm:$0xff] (%p839_p5)  ;;  %v881_v52 = vld [vmem:[#allocation3 + $0x28] sm:$0xff] (%p839_p5)  ;;  %v898_v39 = vmul.f32 (%p839_p5), 0.125, %v882_v62  ;;  %v3590_v58 = vmul.f32 (%p839_p5), 0.125, %v851_v23  ;;  %v883_v28 = vld [vmem:[#allocation3 + $0x38] sm:$0xff] (%p839_p5) }
  0x66   : > { %v908_v46 = vmul.f32 (%p839_p5), %v3555_v3, %v3555_v3  ;;  %v3561_v8 = vmul.f32 (%p839_p5), 0.125, %v846_v29  ;;  %v847_v31 = vld [vmem:[#allocation2 + $0x18] sm:$0xff] (%p839_p5)  ;;  %v897_v1 = vmul.f32 (%p839_p5), 0.125, %v881_v52  ;;  %v913_v11 = vmul.f32 (%p839_p5), %v3573_v42, %v3573_v42  ;;  %v852_v25 = vld [vmem:[#allocation2 + $0x40] sm:$0xff] (%p839_p5)  ;;  %v853_v33 = vld [vmem:[#allocation2 + $0x48] sm:$0xff] (%p839_p5) }
  0x67   : > { %v909_v48 = vmul.f32 %v3557_v57, %v3557_v57  ;;  %v3565_v49 = vmul.f32 0.125, %v847_v31  ;;  %v848_v51 = vld [vmem:[#allocation2 + $0x20] sm:$0xff]  ;;  %v914_v21 = vmul.f32 %v3577_v36, %v3577_v36  ;;  %v899_v44 = vmul.f32 0.125, %v883_v28  ;;  %v885_v41 = vld [vmem:[#allocation3 + $0x48] sm:$0xff]  ;;  %v854_v24 = vld [vmem:[#allocation2 + $0x50] sm:$0xff] }
  0x68   : > { %v924_v10 = vsub.f32 %v892_v6, %v908_v46  ;;  %v910_v30 = vmul.f32 %v3561_v8, %v3561_v8  ;;  %v3569_v37 = vmul.f32 0.125, %v848_v51  ;;  %v929_v20 = vsub.f32 %v897_v1, %v913_v11  ;;  %v884_v13 = vld [vmem:[#allocation3 + $0x40] sm:$0xff] }
  0x69   : > { %v925_v0 = vsub.f32 %v893_v4, %v909_v48  ;;  %v911_v16 = vmul.f32 %v3565_v49, %v3565_v49  ;;  %v930_v12 = vsub.f32 %v898_v39, %v914_v21  ;;  %v915_v22 = vmul.f32 %v3590_v58, %v3590_v58 }
  0x6a   : > { %v940_v2 = vmax.f32 %v924_v10, 0.0  ;;  %v926_v14 = vsub.f32 %v894_v32, %v910_v30  ;;  %v912_v34 = vmul.f32 %v3569_v37, %v3569_v37  ;;  %v945_v35 = vmax.f32 %v929_v20, 0.0 }
  0x6b   : > { %v941_v5 = vmax.f32 %v925_v0, 0.0  ;;  %v927_v9 = vsub.f32 %v895_v61, %v911_v16  ;;  %v946_v40 = vmax.f32 %v930_v12, 0.0  ;;  %v3608_v18 = vmul.f32 0.125, %v852_v25 }
  0x6c   : > { %v3581_v55 = vadd.f32 1e-05, %v940_v2  ;;  %v942_v19 = vmax.f32 %v926_v14, 0.0  ;;  %v928_v60 = vsub.f32 %v896_v43, %v912_v34  ;;  %v3599_v56 = vadd.f32 1e-05, %v945_v35 }
  0x6d   : > { %v3585_v26 = vadd.f32 1e-05, %v941_v5  ;;  %v943_v53 = vmax.f32 %v927_v9, 0.0  ;;  %v3613_v17 = vadd.f32 1e-05, %v946_v40  ;;  %v931_v47 = vsub.f32 %v899_v44, %v915_v22  ;;  %v957_v44 = vld [vmem:[%s4487_s8 + $0x8] sm:$0xff] }
  0x6e   : > { %2655 = vrsqrt.f32 %v3581_v55  ;;  %v3588_v27 = vadd.f32 1e-05, %v942_v19  ;;  %v944_v59 = vmax.f32 %v928_v60, 0.0  ;;  %vm994_vm0 = vweird.f32 %v3581_v55  ;;  %v887_v19 = vld [vmem:[#allocation3 + $0x58] sm:$0xff] }
  0x6f   : > { %2657 = vrsqrt.f32 %v3585_v26  ;;  %v3593_v50 = vadd.f32 1e-05, %v943_v53  ;;  %vm1004_vm4 = vweird.f32 %v3585_v26  ;;  %v900_v4 = vmul.f32 0.125, %v884_v13 }
  0x70   : > { %2659 = vrsqrt.f32 %v3588_v27  ;;  %v3596_v38 = vadd.f32 1e-05, %v944_v59  ;;  %vm1014_vm5 = vweird.f32 %v3588_v27  ;;  %v3615_v29 = vmul.f32 0.125, %v853_v33  ;;  %v956_v59 = vld [vmem:[%s4487_s8] sm:$0xff] }
  0x71   : > { %2661 = vrsqrt.f32 %v3593_v50  ;;  %vm1024_vm6 = vweird.f32 %v3593_v50  ;;  %v916_v32 = vmul.f32 %v3608_v18, %v3608_v18  ;;  %v3625_v31 = vmul.f32 0.125, %v885_v41  ;;  %v958_v41 = vld [vmem:[%s4487_s8 + $0x10] sm:$0xff] }
  0x72   : > { %2663 = vrsqrt.f32 %v3596_v38  ;;  %vm1034_vm8 = vweird.f32 %v3596_v38  ;;  %vm1044_vm10 = vweird.f32 %v3599_v56  ;;  %v3634_v61 = vmul.f32 0.125, %v854_v24 }
  0x73   : > { %2665 = vrsqrt.f32 %v3599_v56  ;;  %v947_v30 = vmax.f32 %v931_v47, 0.0  ;;  %v932_v0 = vsub.f32 %v900_v4, %v916_v32  ;;  %vm1054_vm15 = vweird.f32 %v3613_v17  ;;  %v959_v32 = vld [vmem:[%s4487_s8 + $0x18] sm:$0xff] }
  0x74   : > { %v3610_v6 = vpop.eup %2655  ;;  %2667 = vrsqrt.f32 %v3613_v17 }
  0x75   : > { %v3617_v45 = vpop.eup %2657  ;;  %v989_v46 = vmul.f32 %v3610_v6, %v3581_v55  ;;  %vm995_vm7 = vweird.f32 %v3610_v6  ;;  %v3660_v39 = vadd.f32 1e-05, %v947_v30  ;;  %v948_v20 = vmax.f32 %v932_v0, 0.0  ;;  %v960_v30 = vld [vmem:[%s4487_s8 + $0x20] sm:$0xff] }
  0x76   : > { %v3627_v54 = vpop.eup %2659  ;;  %v999_v48 = vmul.f32 %v3617_v45, %v3585_v26  ;;  %vm1005_vm9 = vweird.f32 %v3617_v45  ;;  %vm3668_vm2 = vmor %vm994_vm0, %vm995_vm7  ;;  %v889_v26 = vld [vmem:[#allocation3 + $0x68] sm:$0xff] }
  0x77   : > { %v3636_v51 = vpop.eup %2661  ;;  %v990_v15 = vmul.f32 %v3610_v6, %v989_v46  ;;  %v1009_v10 = vmul.f32 %v3627_v54, %v3588_v27  ;;  %vm1015_vm12 = vweird.f32 %v3627_v54  ;;  %vm3681_vm3 = vmor %vm1004_vm4, %vm1005_vm9  ;;  %2669 = vrsqrt.f32 %v3660_v39 }
  0x78   : > { %v3642_v43 = vpop.eup %2663  ;;  %v1000_v63 = vmul.f32 %v3617_v45, %v999_v48  ;;  %v1019_v52 = vmul.f32 %v3636_v51, %v3593_v50  ;;  %vm1025_vm13 = vweird.f32 %v3636_v51  ;;  %vm3695_vm0 = vmor %vm1014_vm5, %vm1015_vm12  ;;  %vm1064_vm9 = vweird.f32 %v3660_v39 }
  0x79   : > { %v3648_v16 = vpop.eup %2665  ;;  %v991_v1 = vmul.f32 0.5, %v990_v15  ;;  %v1010_v7 = vmul.f32 %v3627_v54, %v1009_v10  ;;  %v1029_v62 = vmul.f32 %v3642_v43, %v3596_v38  ;;  %vm1035_vm14 = vweird.f32 %v3642_v43  ;;  %vm3711_vm5 = vmor %vm1024_vm6, %vm1025_vm13 }
  0x7a   : > { %v1001_v2 = vmul.f32 0.5, %v1000_v63  ;;  %v1020_v14 = vmul.f32 %v3636_v51, %v1019_v52  ;;  %v1039_v34 = vmul.f32 %v3648_v16, %v3599_v56  ;;  %vm1045_vm1 = vweird.f32 %v3648_v16  ;;  %v3662_v23 = vpop.eup %2667  ;;  %vm3729_vm6 = vmor %vm1034_vm8, %vm1035_vm14 }
  0x7b   : > { %v992_v5 = vsub.f32 1.5, %v991_v1  ;;  %v1011_v9 = vmul.f32 0.5, %v1010_v7  ;;  %v1030_v11 = vmul.f32 %v3642_v43, %v1029_v62  ;;  %v1049_v25 = vmul.f32 %v3662_v23, %v3613_v17  ;;  %vm3746_vm7 = vmor %vm1044_vm10, %vm1045_vm1  ;;  %v961_v1 = vld [vmem:[%s4487_s8 + $0x28] sm:$0xff]  ;;  %v886_v7 = vld [vmem:[#allocation3 + $0x50] sm:$0xff] }
  0x7c   : > { %v1002_v60 = vsub.f32 1.5, %v1001_v2  ;;  %v1021_v21 = vmul.f32 0.5, %v1020_v14  ;;  %v1040_v53 = vmul.f32 %v3648_v16, %v1039_v34  ;;  %vm1055_vm4 = vweird.f32 %v3662_v23  ;;  %v962_v17 = vld [vmem:[%s4487_s8 + $0x30] sm:$0xff] }
  0x7d   : > { %v993_v28 = vmul.f32 %v3610_v6, %v992_v5  ;;  %v1012_v35 = vsub.f32 1.5, %v1011_v9  ;;  %v1031_v12 = vmul.f32 0.5, %v1030_v11  ;;  %v1050_v4 = vmul.f32 %v3662_v23, %v1049_v25  ;;  %vm3780_vm8 = vmor %vm1054_vm15, %vm1055_vm4 }
  0x7e   : > { %v1003_v13 = vmul.f32 %v3617_v45, %v1002_v60  ;;  %v1022_v33 = vsub.f32 1.5, %v1021_v21  ;;  %v1041_v40 = vmul.f32 0.5, %v1040_v53  ;;  %v917_v11 = vmul.f32 %v3615_v29, %v3615_v29  ;;  %v856_v60 = vld [vmem:[#allocation2 + $0x60] sm:$0xff] }
  0x7f   : > { %v997_v22 = vsel %vm3668_vm2, %v3610_v6, %v993_v28  ;;  %v1013_v24 = vmul.f32 %v3627_v54, %v1012_v35  ;;  %v1032_v47 = vsub.f32 1.5, %v1031_v12  ;;  %v1051_v52 = vmul.f32 0.5, %v1050_v4 }
  0x80   : > { %v3716_v46 = vmul.f32 %v997_v22, %v956_v59  ;;  %v1007_v6 = vsel %vm3681_vm3, %v3617_v45, %v1003_v13  ;;  %v1023_v48 = vmul.f32 %v3636_v51, %v1022_v33  ;;  %v1042_v15 = vsub.f32 1.5, %v1041_v40  ;;  %v888_v59 = vld [vmem:[#allocation3 + $0x60] sm:$0xff]  ;;  %v857_v13 = vld [vmem:[#allocation2 + $0x68] sm:$0xff]  ;;  %v2670_v33 = vpop.eup %2669 }
  0x81   : > { %v3733_v10 = vmul.f32 %v1007_v6, %v957_v44  ;;  %v1017_v45 = vsel %vm3695_vm0, %v3627_v54, %v1013_v24  ;;  %v1033_v63 = vmul.f32 %v3642_v43, %v1032_v47  ;;  %v1052_v14 = vsub.f32 1.5, %v1051_v52  ;;  %v858_v24 = vld [vmem:[#allocation2 + $0x70] sm:$0xff] }
  0x82   : > { %1165 = vst.msk [vmem:[#allocation6] sm:$0xff] %vm1164_vm11, %v3716_v46  ;;  %v3752_v0 = vmul.f32 %v1017_v45, %v958_v41  ;;  %v1027_v54 = vsel %vm3711_vm5, %v3636_v51, %v1023_v48  ;;  %v1043_v56 = vmul.f32 %v3648_v16, %v1042_v15  ;;  %v855_v51 = vld [vmem:[#allocation2 + $0x58] sm:$0xff]  ;;  %v902_v53 = vmul.f32 0.125, %v886_v7 }
  0x83   : > { %1166 = vst.msk [vmem:[#allocation6 + $0x8] sm:$0xff] %vm1164_vm11, %v3733_v10  ;;  %v3764_v62 = vmul.f32 %v1027_v54, %v959_v32  ;;  %v1037_v2 = vsel %vm3729_vm6, %v3642_v43, %v1033_v63  ;;  %v3784_v43 = vadd.f32 1e-05, %v948_v20  ;;  %v918_v20 = vmul.f32 %v3634_v61, %v3634_v61  ;;  %v890_v54 = vld [vmem:[#allocation3 + $0x70] sm:$0xff] }
  0x84   : > { %1167 = vst.msk [vmem:[#allocation6 + $0x10] sm:$0xff] %vm1164_vm11, %v3752_v0  ;;  %v3771_v34 = vmul.f32 %v1037_v2, %v960_v30  ;;  %v1047_v5 = vsel %vm3746_vm7, %v3648_v16, %v1043_v56  ;;  %v1053_v16 = vmul.f32 %v3662_v23, %v1052_v14  ;;  %v933_v28 = vsub.f32 %v3625_v31, %v917_v11 }
  0x85   : > { %1168 = vst.msk [vmem:[#allocation6 + $0x18] sm:$0xff] %vm1164_vm11, %v3764_v62  ;;  %v3790_v21 = vmul.f32 %v1047_v5, %v961_v1  ;;  %2671 = vrsqrt.f32 %v3784_v43  ;;  %v3802_v55 = vmul.f32 0.125, %v855_v51  ;;  %v934_v12 = vsub.f32 %v902_v53, %v918_v20  ;;  %v963_v53 = vld [vmem:[%s4487_s8 + $0x38] sm:$0xff] }
  0x86   : > { %1169 = vst.msk [vmem:[#allocation6 + $0x20] sm:$0xff] %vm1164_vm11, %v3771_v34  ;;  %v1057_v35 = vsel %vm3780_vm8, %v3662_v23, %v1053_v16  ;;  %v903_v25 = vmul.f32 0.125, %v887_v19  ;;  %v3809_v44 = vmul.f32 0.125, %v856_v60  ;;  %v949_v22 = vmax.f32 %v933_v28, 0.0  ;;  %v859_v19 = vld [vmem:[#allocation2 + $0x78] sm:$0xff] }
  0x87   : > { %1170 = vst.msk [vmem:[#allocation6 + $0x28] sm:$0xff] %vm1164_vm11, %v3790_v21  ;;  %v3811_v40 = vmul.f32 %v1057_v35, %v962_v17  ;;  %v919_v31 = vmul.f32 %v3802_v55, %v3802_v55  ;;  %v904_v41 = vmul.f32 0.125, %v888_v59  ;;  %v1059_v27 = vmul.f32 %v2670_v33, %v3660_v39  ;;  %v891_v28 = vld [vmem:[#allocation3 + $0x78] sm:$0xff] }
  0x88   : > { %v950_v47 = vmax.f32 %v934_v12, 0.0  ;;  %v920_v23 = vmul.f32 %v3809_v44, %v3809_v44  ;;  %v3820_v4 = vadd.f32 1e-05, %v949_v22  ;;  %v3822_v32 = vmul.f32 0.125, %v857_v13 }
  0x89   : > { %1171 = vst.msk [vmem:[#allocation6 + $0x30] sm:$0xff] %vm1164_vm11, %v3811_v40  ;;  %v935_v6 = vsub.f32 %v903_v25, %v919_v31  ;;  %v905_v48 = vmul.f32 0.125, %v889_v26  ;;  %v1060_v50 = vmul.f32 %v2670_v33, %v1059_v27  ;;  %v3826_v30 = vmul.f32 0.125, %v858_v24 }
  0x8a   : > { %v3824_v15 = vadd.f32 1e-05, %v950_v47  ;;  %v936_v45 = vsub.f32 %v904_v41, %v920_v23  ;;  %2673 = vrsqrt.f32 %v3820_v4  ;;  %v921_v52 = vmul.f32 %v3822_v32, %v3822_v32  ;;  %v964_v47 = vld [vmem:[%s4487_s8 + $0x40] sm:$0xff] }
  0x8b   : > { %v3828_v63 = vpop.eup %2671  ;;  %v951_v38 = vmax.f32 %v935_v6, 0.0  ;;  %v1061_v1 = vmul.f32 0.5, %v1060_v50  ;;  %vm1065_vm10 = vweird.f32 %v2670_v33  ;;  %vm1074_vm12 = vweird.f32 %v3784_v43 }
  0x8c   : > { %v1069_v56 = vmul.f32 %v3828_v63, %v3784_v43  ;;  %2675 = vrsqrt.f32 %v3824_v15  ;;  %v952_v2 = vmax.f32 %v936_v45, 0.0  ;;  %v937_v14 = vsub.f32 %v905_v48, %v921_v52  ;;  %vm3845_vm13 = vmor %vm1064_vm9, %vm1065_vm10 }
  0x8d   : > { %v3838_v7 = vadd.f32 1e-05, %v951_v38  ;;  %v1062_v51 = vsub.f32 1.5, %v1061_v1  ;;  %v906_v9 = vmul.f32 0.125, %v890_v54  ;;  %v922_v11 = vmul.f32 %v3826_v30, %v3826_v30 }
  0x8e   : > { %v1070_v5 = vmul.f32 %v3828_v63, %v1069_v56  ;;  %vm1084_vm14 = vweird.f32 %v3820_v4  ;;  %v3851_v17 = vadd.f32 1e-05, %v952_v2  ;;  %v953_v16 = vmax.f32 %v937_v14, 0.0 }
  0x8f   : > { %2677 = vrsqrt.f32 %v3838_v7  ;;  %v1063_v20 = vmul.f32 %v2670_v33, %v1062_v51  ;;  %vm1075_vm15 = vweird.f32 %v3828_v63  ;;  %v938_v39 = vsub.f32 %v906_v9, %v922_v11 }
  0x90   : > { %v1071_v59 = vmul.f32 0.5, %v1070_v5  ;;  %v3857_v35 = vpop.eup %2673  ;;  %vm1094_vm1 = vweird.f32 %v3824_v15  ;;  %2679 = vrsqrt.f32 %v3851_v17  ;;  %v3861_v12 = vadd.f32 1e-05, %v953_v16  ;;  %vm3876_vm3 = vmor %vm1074_vm12, %vm1075_vm15 }
  0x91   : > { %v3863_v25 = vmul.f32 0.125, %v859_v19  ;;  %v1067_v26 = vsel %vm3845_vm13, %v2670_v33, %v1063_v20  ;;  %v1079_v31 = vmul.f32 %v3857_v35, %v3820_v4  ;;  %vm1104_vm2 = vweird.f32 %v3838_v7  ;;  %v1181_v19 = vld [vmem:[%s4488_s9] sm:$0xff] }
  0x92   : > { %v3865_v13 = vpop.eup %2675  ;;  %v1072_v22 = vsub.f32 1.5, %v1071_v59  ;;  %v3872_v41 = vmul.f32 %v1067_v26, %v963_v53  ;;  %2681 = vrsqrt.f32 %v3861_v12  ;;  %v907_v33 = vmul.f32 0.125, %v891_v28  ;;  %v966_v28 = vld [vmem:[%s4487_s8 + $0x50] sm:$0xff] }
  0x93   : > { %v1089_v27 = vmul.f32 %v3865_v13, %v3824_v15  ;;  %v1080_v6 = vmul.f32 %v3857_v35, %v1079_v31  ;;  %vm1114_vm0 = vweird.f32 %v3851_v17  ;;  %v954_v43 = vmax.f32 %v938_v39, 0.0 }
  0x94   : > { %v1073_v23 = vmul.f32 %v3828_v63, %v1072_v22  ;;  %1172 = vst.msk [vmem:[#allocation6 + $0x38] sm:$0xff] %vm1164_vm11, %v3872_v41  ;;  %vm1085_vm4 = vweird.f32 %v3857_v35  ;;  %vm1095_vm5 = vweird.f32 %v3865_v13  ;;  %v923_v45 = vmul.f32 %v3863_v25, %v3863_v25 }
  0x95   : > { %v3889_v48 = vpop.eup %2677  ;;  %v1090_v50 = vmul.f32 %v3865_v13, %v1089_v27  ;;  %v1081_v52 = vmul.f32 0.5, %v1080_v6  ;;  %vm1124_vm6 = vweird.f32 %v3861_v12  ;;  %v1197_v1 = vmul.f32 %v3716_v46, %v3555_v3  ;;  %vm3928_vm7 = vmor %vm1084_vm14, %vm1085_vm4 }
  0x96   : > { %v1077_v38 = vsel %vm3876_vm3, %v3828_v63, %v1073_v23  ;;  %v1099_v54 = vmul.f32 %v3889_v48, %v3838_v7  ;;  %v3906_v56 = vpop.eup %2679  ;;  %v3910_v51 = vadd.f32 1e-05, %v954_v43  ;;  %v939_v5 = vsub.f32 %v907_v33, %v923_v45  ;;  %vm3942_vm9 = vmor %vm1094_vm1, %vm1095_vm5  ;;  %v1183_v7 = vld [vmem:[%s4488_s9 + $0x10] sm:$0xff] }
  0x97   : > { %v3908_v2 = vmul.f32 %v1077_v38, %v964_v47  ;;  %v1091_v14 = vmul.f32 0.5, %v1090_v50  ;;  %v1082_v9 = vsub.f32 1.5, %v1081_v52  ;;  %v1109_v11 = vmul.f32 %v3906_v56, %v3851_v17  ;;  %v1182_v47 = vld [vmem:[%s4488_s9 + $0x8] sm:$0xff]  ;;  %v967_v50 = vld [vmem:[%s4487_s8 + $0x58] sm:$0xff] }
  0x98   : > { %v1100_v63 = vmul.f32 %v3889_v48, %v1099_v54  ;;  %v1198_v3 = vmul.f32 %v3733_v10, %v3557_v57  ;;  %v3920_v46 = vpop.eup %2681  ;;  %vm1105_vm8 = vweird.f32 %v3889_v48  ;;  %2683 = vrsqrt.f32 %v3910_v51  ;;  %v965_v57 = vld [vmem:[%s4487_s8 + $0x48] sm:$0xff] }
  0x99   : > { %1173 = vst.msk [vmem:[#allocation6 + $0x40] sm:$0xff] %vm1164_vm11, %v3908_v2  ;;  %v1092_v16 = vsub.f32 1.5, %v1091_v14  ;;  %v955_v53 = vmax.f32 %v939_v5, 0.0  ;;  %v1083_v10 = vmul.f32 %v3857_v35, %v1082_v9  ;;  %v1110_v59 = vmul.f32 %v3906_v56, %v1109_v11  ;;  %vm3970_vm12 = vmor %vm1104_vm2, %vm1105_vm8  ;;  %v1184_v5 = vld [vmem:[%s4488_s9 + $0x18] sm:$0xff] }
  0x9a   : > { %v1101_v20 = vmul.f32 0.5, %v1100_v63  ;;  %v1119_v39 = vmul.f32 %v3920_v46, %v3861_v12  ;;  %vm1115_vm10 = vweird.f32 %v3906_v56  ;;  %v1213_v15 = vsub.f32 %v1181_v19, %v1197_v1  ;;  %v969_v12 = vld [vmem:[%s4487_s8 + $0x68] sm:$0xff] }
  0x9b   : > { %v1093_v26 = vmul.f32 %v3865_v13, %v1092_v16  ;;  %v3954_v22 = vadd.f32 1e-05, %v955_v53  ;;  %v1087_v31 = vsel %vm3928_vm7, %v3857_v35, %v1083_v10  ;;  %v1111_v27 = vmul.f32 0.5, %v1110_v59  ;;  %vm3991_vm14 = vmor %vm1114_vm0, %vm1115_vm10  ;;  %v1186_v53 = vld [vmem:[%s4488_s9 + $0x28] sm:$0xff] }
  0x9c   : > { %v1102_v24 = vsub.f32 1.5, %v1101_v20  ;;  %v1120_v33 = vmul.f32 %v3920_v46, %v1119_v39  ;;  %v1157_v23 = vmul.f32 %v1087_v31, %v965_v57  ;;  %vm1125_vm13 = vweird.f32 %v3920_v46  ;;  %1229 = vst.msk [vmem:[#allocation7] sm:$0xff] %vm1164_vm11, %v1213_v15  ;;  %v1187_v57 = vld [vmem:[%s4488_s9 + $0x30] sm:$0xff] }
  0x9d   : > { %v1097_v6 = vsel %vm3942_vm9, %v3865_v13, %v1093_v26  ;;  %2685 = vrsqrt.f32 %v3954_v22  ;;  %v1112_v45 = vsub.f32 1.5, %v1111_v27  ;;  %v1214_v1 = vsub.f32 %v1182_v47, %v1198_v3  ;;  %vm4018_vm15 = vmor %vm1124_vm6, %vm1125_vm13 }
  0x9e   : > { %v1158_v35 = vmul.f32 %v1097_v6, %v966_v28  ;;  %v1103_v13 = vmul.f32 %v3889_v48, %v1102_v24  ;;  %v1121_v38 = vmul.f32 0.5, %v1120_v33  ;;  %v3984_v52 = vpop.eup %2683  ;;  %1174 = vst.msk [vmem:[#allocation6 + $0x48] sm:$0xff] %vm1164_vm11, %v1157_v23  ;;  %v1199_v14 = vmul.f32 %v3752_v0, %v3561_v8  ;;  %v968_v8 = vld [vmem:[%s4487_s8 + $0x60] sm:$0xff]  ;;  %v1191_v6 = vld [vmem:[%s4488_s9 + $0x50] sm:$0xff] }
  0x9f   : > { %v1200_v9 = vmul.f32 %v3764_v62, %v3565_v49  ;;  %v1201_v63 = vmul.f32 %v3771_v34, %v3569_v37  ;;  %v1113_v0 = vmul.f32 %v3906_v56, %v1112_v45  ;;  %v1129_v19 = vmul.f32 %v3984_v52, %v3910_v51  ;;  %1230 = vst.msk [vmem:[#allocation7 + $0x8] sm:$0xff] %vm1164_vm11, %v1214_v1  ;;  %v1185_v34 = vld [vmem:[%s4488_s9 + $0x20] sm:$0xff] }
  0xa0   : > { %1175 = vst.msk [vmem:[#allocation6 + $0x50] sm:$0xff] %vm1164_vm11, %v1158_v35  ;;  %v1107_v17 = vsel %vm3970_vm12, %v3889_v48, %v1103_v13  ;;  %v1122_v11 = vsub.f32 1.5, %v1121_v38  ;;  %vm1134_vm1 = vweird.f32 %v3910_v51  ;;  %vm1135_vm2 = vweird.f32 %v3984_v52 }
  0xa1   : > { %v1159_v49 = vmul.f32 %v1107_v17, %v967_v50  ;;  %v1215_v62 = vsub.f32 %v1183_v7, %v1199_v14  ;;  %v1117_v48 = vsel %vm3991_vm14, %v3906_v56, %v1113_v0  ;;  %v1130_v60 = vmul.f32 %v3984_v52, %v1129_v19  ;;  %vm4070_vm3 = vmor %vm1134_vm1, %vm1135_vm2  ;;  %v1194_v14 = vld [vmem:[%s4488_s9 + $0x68] sm:$0xff] }
  0xa2   : > { %v1123_v3 = vmul.f32 %v3920_v46, %v1122_v11  ;;  %v1216_v16 = vsub.f32 %v1184_v5, %v1200_v9  ;;  %v1160_v56 = vmul.f32 %v1117_v48, %v968_v8  ;;  %v1202_v4 = vmul.f32 %v3790_v21, %v3573_v42  ;;  %v1188_v42 = vld [vmem:[%s4488_s9 + $0x38] sm:$0xff]  ;;  %v1195_v5 = vld [vmem:[%s4488_s9 + $0x70] sm:$0xff] }
  0xa3   : > { %v2686_v10 = vpop.eup %2685  ;;  %1176 = vst.msk [vmem:[#allocation6 + $0x58] sm:$0xff] %vm1164_vm11, %v1159_v49  ;;  %v1203_v20 = vmul.f32 %v3811_v40, %v3577_v36  ;;  %v1204_v59 = vmul.f32 %v3872_v41, %v3590_v58  ;;  %v1131_v28 = vmul.f32 0.5, %v1130_v60  ;;  %v1217_v15 = vsub.f32 %v1185_v34, %v1201_v63  ;;  %v1189_v58 = vld [vmem:[%s4488_s9 + $0x40] sm:$0xff]  ;;  %v1196_v11 = vld [vmem:[%s4488_s9 + $0x78] sm:$0xff] }
  0xa4   : > { %v1127_v39 = vsel %vm4018_vm15, %v3920_v46, %v1123_v3  ;;  %v1139_v26 = vmul.f32 %v2686_v10, %v3954_v22  ;;  %1231 = vst.msk [vmem:[#allocation7 + $0x10] sm:$0xff] %vm1164_vm11, %v1215_v62  ;;  %v1218_v21 = vsub.f32 %v1186_v53, %v1202_v4  ;;  %v1205_v31 = vmul.f32 %v3908_v2, %v3608_v18  ;;  %v1190_v18 = vld [vmem:[%s4488_s9 + $0x48] sm:$0xff]  ;;  %v970_v2 = vld [vmem:[%s4487_s8 + $0x70] sm:$0xff] }
  0xa5   : > { %1177 = vst.msk [vmem:[#allocation6 + $0x60] sm:$0xff] %vm1164_vm11, %v1160_v56  ;;  %v1161_v36 = vmul.f32 %v1127_v39, %v969_v12  ;;  %v1219_v40 = vsub.f32 %v1187_v57, %v1203_v20  ;;  %v1132_v41 = vsub.f32 1.5, %v1131_v28  ;;  %v1206_v24 = vmul.f32 %v1157_v23, %v3615_v29 }
  0xa6   : > { %v1140_v46 = vmul.f32 %v2686_v10, %v1139_v26  ;;  %1232 = vst.msk [vmem:[#allocation7 + $0x18] sm:$0xff] %vm1164_vm11, %v1216_v16  ;;  %vm1144_vm0 = vweird.f32 %v3954_v22  ;;  %vm1145_vm4 = vweird.f32 %v2686_v10  ;;  %v1220_v33 = vsub.f32 %v1188_v42, %v1204_v59 }
  0xa7   : > { %1178 = vst.msk [vmem:[#allocation6 + $0x68] sm:$0xff] %vm1164_vm11, %v1161_v36  ;;  %v1207_v29 = vmul.f32 %v1158_v35, %v3634_v61  ;;  %v1133_v51 = vmul.f32 %v3984_v52, %v1132_v41  ;;  %v1221_v23 = vsub.f32 %v1189_v58, %v1205_v31  ;;  %v1208_v43 = vmul.f32 %v1159_v49, %v3802_v55  ;;  %v1192_v61 = vld [vmem:[%s4488_s9 + $0x58] sm:$0xff]  ;;  %vm4100_vm5 = vmor %vm1144_vm0, %vm1145_vm4 }
  0xa8   : > { %v1141_v47 = vmul.f32 0.5, %v1140_v46  ;;  %1233 = vst.msk [vmem:[#allocation7 + $0x20] sm:$0xff] %vm1164_vm11, %v1217_v15  ;;  %v1222_v13 = vsub.f32 %v1190_v18, %v1206_v24  ;;  %v1209_v45 = vmul.f32 %v1160_v56, %v3809_v44  ;;  %v1210_v54 = vmul.f32 %v1161_v36, %v3822_v32  ;;  %v971_v44 = vld [vmem:[%s4487_s8 + $0x78] sm:$0xff] }
  0xa9   : > { %1234 = vst.msk [vmem:[#allocation7 + $0x28] sm:$0xff] %vm1164_vm11, %v1218_v21  ;;  %v1137_v35 = vsel %vm4070_vm3, %v3984_v52, %v1133_v51  ;;  %v1223_v7 = vsub.f32 %v1191_v6, %v1207_v29  ;;  %v1193_v52 = vld [vmem:[%s4488_s9 + $0x60] sm:$0xff]  ;;  %v1224_v22 = vsub.f32 %v1192_v61, %v1208_v43 }
  0xaa   : > { %v1142_v50 = vsub.f32 1.5, %v1141_v47  ;;  %1235 = vst.msk [vmem:[#allocation7 + $0x30] sm:$0xff] %vm1164_vm11, %v1219_v40  ;;  %v1162_v38 = vmul.f32 %v1137_v35, %v970_v2  ;;  %v1225_v63 = vsub.f32 %v1193_v52, %v1209_v45  ;;  %v1226_v8 = vsub.f32 %v1194_v14, %v1210_v54 }
  0xab   : > { %1236 = vst.msk [vmem:[#allocation7 + $0x38] sm:$0xff] %vm1164_vm11, %v1220_v33 }
  0xac   : > { %v1143_v1 = vmul.f32 %v2686_v10, %v1142_v50  ;;  %1237 = vst.msk [vmem:[#allocation7 + $0x40] sm:$0xff] %vm1164_vm11, %v1221_v23  ;;  %v1211_v32 = vmul.f32 %v1162_v38, %v3826_v30 }
  0xad   : > { %1179 = vst.msk [vmem:[#allocation6 + $0x70] sm:$0xff] %vm1164_vm11, %v1162_v38 }
  0xae   : > { %v1147_v9 = vsel %vm4100_vm5, %v2686_v10, %v1143_v1  ;;  %1238 = vst.msk [vmem:[#allocation7 + $0x48] sm:$0xff] %vm1164_vm11, %v1222_v13  ;;  %v1227_v0 = vsub.f32 %v1195_v5, %v1211_v32 }
  0xaf   : > { %v1163_v17 = vmul.f32 %v1147_v9, %v971_v44  ;;  %1239 = vst.msk [vmem:[#allocation7 + $0x50] sm:$0xff] %vm1164_vm11, %v1223_v7 }
  0xb0   : > { %1240 = vst.msk [vmem:[#allocation7 + $0x58] sm:$0xff] %vm1164_vm11, %v1224_v22 }
  0xb1   : > { %1180 = vst.msk [vmem:[#allocation6 + $0x78] sm:$0xff] %vm1164_vm11, %v1163_v17  ;;  %v1212_v30 = vmul.f32 %v1163_v17, %v3863_v25 }
  0xb2   : > { %1241 = vst.msk [vmem:[#allocation7 + $0x60] sm:$0xff] %vm1164_vm11, %v1225_v63 }
  0xb3   : > { %1242 = vst.msk [vmem:[#allocation7 + $0x68] sm:$0xff] %vm1164_vm11, %v1226_v8  ;;  %v1228_v19 = vsub.f32 %v1196_v11, %v1212_v30 }
  0xb4   : > { %1243 = vst.msk [vmem:[#allocation7 + $0x70] sm:$0xff] %vm1164_vm11, %v1227_v0 }
  0xb5   : > { %1244 = vst.msk [vmem:[#allocation7 + $0x78] sm:$0xff] %vm1164_vm11, %v1228_v19 }
  0xb6 PF: > { %v1509_v49 = vld [vmem:[#allocation5 + $0x70] sm:$0xff]  ;;  %v1395_v62 = vld [vmem:[#allocation4 + $0x60] sm:$0xff]  ;;  %v2722_v34 = vmov 0   ;;  %v2575_v12 = vld [vmem:[%s4480_s1 + $0x28] sm:$0xff]  ;;  %vm1309_vm11 = vcmask 130048   ;;  %p2561_p6 = scmp.ne.s32.totalorder %s2711_s19, 0 }
  0xb7   : > { %v1397_v37 = vld [vmem:[#allocation4 + $0x70] sm:$0xff]  ;;  %2689 = vset.pattern.permute.xlu2 %v2722_v34  ;;  %2688 = vset.pattern.permute.xlu1 %v2722_v34  ;;  %v2578_v25 = vld [vmem:[%s4479_s0] sm:$0xff]  ;;  %v1510_v3 = vld [vmem:[#allocation5 + $0x78] sm:$0xff] }
  0xb8   : > { %2687 = vset.pattern.permute.xlu0 %v2722_v34  ;;  %1583 = vperm.xlu1 %2688, %v1509_v49   ;;  %v2570_v48 = vld [vmem:[%s4480_s1] sm:$0xff]  ;;  %v1398_v60 = vld [vmem:[#allocation4 + $0x78] sm:$0xff]  ;;  %v1396_v16 = vld [vmem:[#allocation4 + $0x68] sm:$0xff] }
  0xb9   : > { %1471 = vperm.xlu0 %2687, %v1397_v37   ;;  %1461 = vperm.xlu2 %2689, %v1395_v62   ;;  %v1508_v53 = vld [vmem:[#allocation5 + $0x68] sm:$0xff]  ;;  %v1507_v57 = vld [vmem:[#allocation5 + $0x60] sm:$0xff]  ;;  %v1393_v10 = vld [vmem:[#allocation4 + $0x50] sm:$0xff] }
  0xba   : > { %1341 = vmatpush.bf16.msra.mxu0 %v2578_v25  ;;  %2587 = vmatpush.bf16.msra.mxu3 %v2578_v25  ;;  %v2571_v56 = vld [vmem:[%s4480_s1 + $0x8] sm:$0xff]  ;;  %v2576_v4 = vld [vmem:[%s4480_s1 + $0x30] sm:$0xff]  ;;  %v1394_v59 = vld [vmem:[#allocation4 + $0x58] sm:$0xff] }
  0xbb   : > { %v1505_v20 = vld [vmem:[#allocation5 + $0x50] sm:$0xff]  ;;  %v1506_v39 = vld [vmem:[#allocation5 + $0x58] sm:$0xff]  ;;  %v1392_v28 = vld [vmem:[#allocation4 + $0x48] sm:$0xff] }
  0xbc   : > { %v1503_v26 = vld [vmem:[#allocation5 + $0x40] sm:$0xff]  ;;  %v2572_v42 = vld [vmem:[%s4480_s1 + $0x10] sm:$0xff]  ;;  %v2577_v36 = vld [vmem:[%s4480_s1 + $0x38] sm:$0xff] }
  0xbd   : > { %2521 = vmatmul.msk.bf16.vlgmr.msra.gmra.mxu0 %vm1309_vm11, %v2570_v48  ;;  %2526 = vmatmul.msk.bf16.vlgmr.msra.gmra.mxu3 %vm1309_vm11, %v2575_v12  ;;  %v1391_v15 = vld [vmem:[#allocation4 + $0x40] sm:$0xff]  ;;  %v1389_v21 = vld [vmem:[#allocation4 + $0x30] sm:$0xff]  ;;  %v1504_v40 = vld [vmem:[#allocation5 + $0x48] sm:$0xff] }
  0xbe   : > { %v1390_v58 = vld [vmem:[#allocation4 + $0x38] sm:$0xff]  ;;  %v1501_v46 = vld [vmem:[#allocation5 + $0x30] sm:$0xff]  ;;  %v1387_v31 = vld [vmem:[#allocation4 + $0x20] sm:$0xff] }
  0xbf   : > { %v1502_v41 = vld [vmem:[#allocation5 + $0x38] sm:$0xff]  ;;  %v1499_v27 = vld [vmem:[#allocation5 + $0x20] sm:$0xff]  ;;  %v1388_v33 = vld [vmem:[#allocation4 + $0x28] sm:$0xff] }
  0xc0   : > { %1588 = vperm.xlu1 %2688, %v1510_v3   ;;  %v2573_v24 = vld [vmem:[%s4480_s1 + $0x18] sm:$0xff]  ;;  %v1500_v18 = vld [vmem:[#allocation5 + $0x28] sm:$0xff]  ;;  %v1497_v2 = vld [vmem:[#allocation5 + $0x10] sm:$0xff] }
  0xc1   : > { %1476 = vperm.xlu0 %2687, %v1398_v60   ;;  %1466 = vperm.xlu2 %2689, %v1396_v16   ;;  %v1386_v29 = vld [vmem:[#allocation4 + $0x18] sm:$0xff]  ;;  %v1385_v51 = vld [vmem:[#allocation4 + $0x10] sm:$0xff]  ;;  %v2574_v47 = vld [vmem:[%s4480_s1 + $0x20] sm:$0xff] }
  0xc2   : > { %v1383_v23 = vld [vmem:[#allocation4] sm:$0xff]  ;;  %v1498_v6 = vld [vmem:[#allocation5 + $0x18] sm:$0xff]  ;;  %v1384_v43 = vld [vmem:[#allocation4 + $0x8] sm:$0xff] }
  0xc3   : > { %v1496_v61 = vld [vmem:[#allocation5 + $0x8] sm:$0xff]  ;;  %v1495_v35 = vld [vmem:[#allocation5] sm:$0xff] }
  0xc8   : > { %1578 = vperm.xlu1 %2688, %v1508_v53  }
  0xc9   : > { %1573 = vperm.xlu0 %2687, %v1507_v57   ;;  %1451 = vperm.xlu2 %2689, %v1393_v10  }
  0xcd   : > { %2522 = vmatmul.msk.bf16.gmra.mxu0 %vm1309_vm11, %v2571_v56  ;;  %2527 = vmatmul.msk.bf16.gmra.mxu3 %vm1309_vm11, %v2576_v4 }
  0xd0   : > { %1563 = vperm.xlu1 %2688, %v1505_v20  }
  0xd1   : > { %1456 = vperm.xlu0 %2687, %v1394_v59   ;;  %1568 = vperm.xlu2 %2689, %v1506_v39  }
  0xd8   : > { %1446 = vperm.xlu1 %2688, %v1392_v28  }
  0xd9   : > { %1553 = vperm.xlu2 %2689, %v1503_v26   ;;  %1441 = vperm.xlu0 %2687, %v1391_v15  }
  0xdd   : > { %2523 = vmatmul.msk.bf16.gmra.mxu0 %vm1309_vm11, %v2572_v42  ;;  %2528 = vmatmul.msk.bf16.gmra.mxu3 %vm1309_vm11, %v2577_v36 }
  0xe0   : > { %1431 = vperm.xlu1 %2688, %v1389_v21  }
  0xe1   : > { %1558 = vperm.xlu0 %2687, %v1504_v40   ;;  %1436 = vperm.xlu2 %2689, %v1390_v58  }
  0xe8   : > { %1548 = vperm.xlu1 %2688, %v1502_v41  }
  0xe9   : > { %1543 = vperm.xlu0 %2687, %v1501_v46   ;;  %1421 = vperm.xlu2 %2689, %v1387_v31  }
  0xed   : > { %2524 = vmatmul.msk.bf16.gmra.mxu0 %vm1309_vm11, %v2573_v24 }
  0xf0   : > { %1533 = vperm.xlu1 %2688, %v1499_v27  }
  0xf1   : > { %1426 = vperm.xlu0 %2687, %v1388_v33   ;;  %1538 = vperm.xlu2 %2689, %v1500_v18  }
  0xf8   : > { %1416 = vperm.xlu1 %2688, %v1386_v29  }
  0xf9   : > { %1523 = vperm.xlu2 %2689, %v1497_v2   ;;  %1411 = vperm.xlu0 %2687, %v1385_v51  }
  0xfd   : > { %2525 = vmatmul.msk.bf16.gmra.mxu0 %vm1309_vm11, %v2574_v47 }
 0x100   : > { %1401 = vperm.xlu1 %2688, %v1383_v23  }
 0x101   : > { %1528 = vperm.xlu0 %2687, %v1498_v6   ;;  %1406 = vperm.xlu2 %2689, %v1384_v43  }
 0x108   : > { %1518 = vperm.xlu1 %2688, %v1496_v61  }
 0x109   : > { %1513 = vperm.xlu0 %2687, %v1495_v35  }
 0x113   : > { %v1462_v50 = vpop.permute.xlu2 %1461 }
 0x11b   : > { %v1467_v13 = vpop.permute.xlu2 %1466 }
 0x123   : > { %v1452_v55 = vpop.permute.xlu2 %1451 }
 0x12a   : > { %v1584_v45 = vpop.permute.xlu1 %1583 }
 0x12b   : > { %v1472_v38 = vpop.permute.xlu0 %1471  ;;  %v1569_v54 = vpop.permute.xlu2 %1568 }
 0x132   : > { %v1589_v7 = vpop.permute.xlu1 %1588 }
 0x133   : > { %v1477_v52 = vpop.permute.xlu0 %1476  ;;  %v4174_v9 = vpop.permute.xlu2 %1553 }
 0x13a   : > { %v4170_v44 = vpop.f32.mrf.mxu0  ;;  %v1579_v1 = vpop.permute.xlu1 %1578 }
 0x13b   : > { %v1574_v22 = vpop.permute.xlu0 %1573  ;;  %v4182_v30 = vpop.permute.xlu2 %1436 }
 0x140   : > { %v1368_v14 = vpop.f32.mrf.mxu3 }
 0x141   : > { %v1489_v21 = vmul.f32 %v1452_v55, %v1368_v14 }
 0x142   : > { %v4172_v5 = vpop.f32.mrf.mxu0  ;;  %v1564_v32 = vpop.permute.xlu1 %1563 }
 0x143   : > { %v1457_v63 = vpop.permute.xlu0 %1456  ;;  %v4190_v34 = vpop.permute.xlu2 %1421  ;;  %v1601_v18 = vadd.f32 %v1564_v32, %v1489_v21 }
 0x145   : > { %v1633_v35 = vmul.f32 0.2, %v1601_v18  ;;  %vm1617_vm12 = vcmp.gt.f32.partialorder %v1601_v18, 0.0 }
 0x148   : > { %v1370_v17 = vpop.f32.mrf.mxu3 }
 0x149   : > { %v1490_v28 = vmul.f32 %v1457_v63, %v1370_v17 }
 0x14a   : > { %v4176_v8 = vpop.f32.mrf.mxu0  ;;  %v4178_v0 = vpop.permute.xlu1 %1446 }
 0x14b   : > { %v4180_v11 = vpop.permute.xlu0 %1441  ;;  %v4198_v16 = vpop.permute.xlu2 %1538  ;;  %v1602_v24 = vadd.f32 %v1569_v54, %v1490_v28 }
 0x14d   : > { %v1634_v6 = vmul.f32 0.2, %v1602_v24  ;;  %vm1618_vm10 = vcmp.gt.f32.partialorder %v1602_v24, 0.0 }
 0x150   : > { %v1373_v19 = vpop.f32.mrf.mxu3 }
 0x151   : > { %v1491_v20 = vmul.f32 %v1462_v50, %v1373_v19 }
 0x152   : > { %v4184_v49 = vpop.f32.mrf.mxu0  ;;  %v4186_v37 = vpop.permute.xlu1 %1431 }
 0x153   : > { %v4188_v62 = vpop.permute.xlu0 %1558  ;;  %v1603_v40 = vadd.f32 %v1574_v22, %v1491_v20  ;;  %v4210_v31 = vpop.permute.xlu2 %1523 }
 0x155   : > { %v1635_v51 = vmul.f32 0.2, %v1603_v40  ;;  %vm1619_vm9 = vcmp.gt.f32.partialorder %v1603_v40, 0.0 }
 0x158   : > { %v1375_v25 = vpop.f32.mrf.mxu3 }
 0x159   : > { %v1492_v4 = vmul.f32 %v1467_v13, %v1375_v25  ;;  %v1651_v13 = vsel %vm1619_vm9, %v1603_v40, %v1635_v51  ;;  %v2583_v51 = vld [vmem:[%s4481_s2 + $0x20] sm:$0xff] }
 0x15a   : > { %v4192_v48 = vpop.f32.mrf.mxu0  ;;  %v4194_v12 = vpop.permute.xlu1 %1548 }
 0x15b   : > { %v4196_v3 = vpop.permute.xlu0 %1543  ;;  %v1604_v26 = vadd.f32 %v1579_v1, %v1492_v4  ;;  %v1407_v55 = vpop.permute.xlu2 %1406  ;;  %v1483_v40 = vmul.f32 %v4190_v34, %v4192_v48 }
 0x15c   : > { %v1480_v54 = vmul.f32 %v1407_v55, %v4172_v5 }
 0x15d   : > { %v1636_v33 = vmul.f32 0.2, %v1604_v26  ;;  %vm1620_vm8 = vcmp.gt.f32.partialorder %v1604_v26, 0.0 }
 0x15f   : > { %v1652_v23 = vsel %vm1620_vm8, %v1604_v26, %v1636_v33 }
 0x160   : > { %v1378_v60 = vpop.f32.mrf.mxu3 }
 0x161   : > { %v1493_v10 = vmul.f32 %v1472_v38, %v1378_v60  ;;  %v1650_v38 = vsel %vm1618_vm10, %v1602_v24, %v1634_v6  ;;  %v2581_v6 = vld [vmem:[%s4481_s2 + $0x10] sm:$0xff] }
 0x162   : > { %v4200_v53 = vpop.f32.mrf.mxu0  ;;  %v4202_v57 = vpop.permute.xlu1 %1533 }
 0x163   : > { %v4204_v56 = vpop.permute.xlu0 %1426  ;;  %v1605_v59 = vadd.f32 %v1584_v45, %v1493_v10  ;;  %v1677_v45 = vpack.c.bf16 %v1652_v23, %v1651_v13  ;;  %v2584_v23 = vld [vmem:[%s4481_s2 + $0x28] sm:$0xff] }
 0x164   : > { %v1484_v28 = vmul.f32 %v4204_v56, %v4200_v53  ;;  %v1595_v53 = vadd.f32 %v4202_v57, %v1483_v40 }
 0x165   : > { %v1637_v46 = vmul.f32 0.2, %v1605_v59  ;;  %vm1621_vm6 = vcmp.gt.f32.partialorder %v1605_v59, 0.0 }
 0x166   : > { %vm1611_vm4 = vcmp.gt.f32.partialorder %v1595_v53, 0.0 }
 0x167   : > { %v1653_v29 = vsel %vm1621_vm6, %v1605_v59, %v1637_v46  ;;  %v1627_v46 = vmul.f32 0.2, %v1595_v53 }
 0x168   : > { %v1380_v39 = vpop.f32.mrf.mxu3 }
 0x169   : > { %v1494_v15 = vmul.f32 %v1477_v52, %v1380_v39 }
 0x16a   : > { %v1358_v42 = vpop.f32.mrf.mxu0  ;;  %v4206_v36 = vpop.permute.xlu1 %1416 }
 0x16b   : > { %v1606_v58 = vadd.f32 %v1589_v7, %v1494_v15  ;;  %v4208_v41 = vpop.permute.xlu0 %1411  ;;  %v1649_v7 = vsel %vm1617_vm12, %v1601_v18, %v1633_v35  ;;  %v1485_v5 = vmul.f32 %v4186_v37, %v1358_v42  ;;  %v2586_v35 = vld [vmem:[%s4481_s2 + $0x38] sm:$0xff] }
 0x16c   : > { %v1676_v52 = vpack.c.bf16 %v1650_v38, %v1649_v7 }
 0x16d   : > { %vm1622_vm7 = vcmp.gt.f32.partialorder %v1606_v58, 0.0  ;;  %v1638_v27 = vmul.f32 0.2, %v1606_v58  ;;  %v1597_v15 = vadd.f32 %v4196_v3, %v1485_v5 }
 0x16f   : > { %v1654_v2 = vsel %vm1622_vm7, %v1606_v58, %v1638_v27  ;;  %v1629_v56 = vmul.f32 0.2, %v1597_v15  ;;  %vm1613_vm3 = vcmp.gt.f32.partialorder %v1597_v15, 0.0 }
 0x170   : > { %v1678_v47 = vpack.c.bf16 %v1654_v2, %v1653_v29 }
 0x171   : > { %v1645_v24 = vsel %vm1613_vm3, %v1597_v15, %v1629_v56 }
 0x172   : > { %v1360_v43 = vpop.f32.mrf.mxu0  ;;  %1727 = vmatpush.bf16.msra.mxu1 %v1678_v47  ;;  %2588 = vmatpush.bf16.msra.mxu2 %v1678_v47  ;;  %v1402_v61 = vpop.permute.xlu1 %1401  ;;  %v2580_v47 = vld [vmem:[%s4481_s2 + $0x8] sm:$0xff] }
 0x173   : > { %v1529_v50 = vpop.permute.xlu0 %1528  ;;  %v1479_v1 = vmul.f32 %v1402_v61, %v4170_v44  ;;  %v1486_v10 = vmul.f32 %v4182_v30, %v1360_v43  ;;  %v2585_v43 = vld [vmem:[%s4481_s2 + $0x30] sm:$0xff]  ;;  %v2582_v61 = vld [vmem:[%s4481_s2 + $0x18] sm:$0xff] }
 0x175   : > { %v1598_v26 = vadd.f32 %v4194_v12, %v1486_v10  ;;  %v1482_v12 = vmul.f32 %v4206_v36, %v4184_v49 }
 0x176   : > { %1728 = vmatpush.bf16.msra.mxu1 %v1677_v45  ;;  %2589 = vmatpush.bf16.msra.mxu2 %v1677_v45 }
 0x177   : > { %v1630_v42 = vmul.f32 0.2, %v1598_v26  ;;  %vm1614_vm2 = vcmp.gt.f32.partialorder %v1598_v26, 0.0  ;;  %v1594_v34 = vadd.f32 %v1529_v50, %v1482_v12 }
 0x179   : > { %v1646_v48 = vsel %vm1614_vm2, %v1598_v26, %v1630_v42  ;;  %v1626_v36 = vmul.f32 0.2, %v1594_v34  ;;  %vm1610_vm5 = vcmp.gt.f32.partialorder %v1594_v34, 0.0 }
 0x17a   : > { %v1363_v22 = vpop.f32.mrf.mxu0  ;;  %1729 = vmatpush.bf16.msra.mxu1 %v1676_v52  ;;  %2590 = vmatpush.bf16.msra.mxu2 %v1676_v52  ;;  %v1519_v14 = vpop.permute.xlu1 %1518  ;;  %v1674_v49 = vpack.c.bf16 %v1646_v48, %v1645_v24 }
 0x17b   : > { %v1514_v32 = vpop.permute.xlu0 %1513  ;;  %v1592_v63 = vadd.f32 %v1519_v14, %v1480_v54  ;;  %v1487_v19 = vmul.f32 %v4180_v11, %v1363_v22  ;;  %v1642_v18 = vsel %vm1610_vm5, %v1594_v34, %v1626_v36 }
 0x17c   : > { %v1591_v17 = vadd.f32 %v1514_v32, %v1479_v1 }
 0x17d   : > { %v1624_v25 = vmul.f32 0.2, %v1592_v63  ;;  %vm1608_vm13 = vcmp.gt.f32.partialorder %v1592_v63, 0.0  ;;  %v1599_v44 = vadd.f32 %v4174_v9, %v1487_v19  ;;  %v1596_v9 = vadd.f32 %v4198_v16, %v1484_v28 }
 0x17e   : > { %v1623_v60 = vmul.f32 0.2, %v1591_v17  ;;  %vm1607_vm14 = vcmp.gt.f32.partialorder %v1591_v17, 0.0 }
 0x17f   : > { %v1640_v4 = vsel %vm1608_vm13, %v1592_v63, %v1624_v25  ;;  %v1631_v30 = vmul.f32 0.2, %v1599_v44  ;;  %vm1615_vm15 = vcmp.gt.f32.partialorder %v1599_v44, 0.0  ;;  %v1628_v16 = vmul.f32 0.2, %v1596_v9 }
 0x180   : > { %v1639_v20 = vsel %vm1607_vm14, %v1591_v17, %v1623_v60  ;;  %vm1612_vm0 = vcmp.gt.f32.partialorder %v1596_v9, 0.0 }
 0x181   : > { %v1671_v59 = vpack.c.bf16 %v1640_v4, %v1639_v20  ;;  %v1644_v27 = vsel %vm1612_vm0, %v1596_v9, %v1628_v16 }
 0x182   : > { %v1365_v39 = vpop.f32.mrf.mxu0 }
 0x183   : > { %v1488_v11 = vmul.f32 %v4178_v0, %v1365_v39  ;;  %v1481_v0 = vmul.f32 %v4208_v41, %v4176_v8  ;;  %v1643_v8 = vsel %vm1611_vm4, %v1595_v53, %v1627_v46 }
 0x184   : > { %v1673_v33 = vpack.c.bf16 %v1644_v27, %v1643_v8 }
 0x185   : > { %v1600_v21 = vadd.f32 %v4188_v62, %v1488_v11  ;;  %v1647_v62 = vsel %vm1615_vm15, %v1599_v44, %v1631_v30  ;;  %v1593_v57 = vadd.f32 %v4210_v31, %v1481_v0  ;;  %v2579_v31 = vld [vmem:[%s4481_s2] sm:$0xff] }
 0x187   : > { %vm1616_vm1 = vcmp.gt.f32.partialorder %v1600_v21, 0.0  ;;  %v1632_v37 = vmul.f32 0.2, %v1600_v21  ;;  %v1625_v41 = vmul.f32 0.2, %v1593_v57  ;;  %vm1609_vm11 = vcmp.gt.f32.partialorder %v1593_v57, 0.0 }
 0x189   : > { %v1648_v3 = vsel %vm1616_vm1, %v1600_v21, %v1632_v37  ;;  %v1641_v29 = vsel %vm1609_vm11, %v1593_v57, %v1625_v41 }
 0x18a   : > { %v1675_v58 = vpack.c.bf16 %v1648_v3, %v1647_v62  ;;  %v1672_v2 = vpack.c.bf16 %v1642_v18, %v1641_v29 }
 0x18c   : > { %1730 = vmatpush.bf16.msra.mxu1 %v1675_v58  ;;  %2591 = vmatpush.bf16.msra.mxu2 %v1675_v58 }
 0x190   : > { %1731 = vmatpush.bf16.msra.mxu1 %v1674_v49  ;;  %2592 = vmatpush.bf16.msra.mxu2 %v1674_v49 }
 0x194   : > { %1732 = vmatpush.bf16.msra.mxu1 %v1673_v33  ;;  %2593 = vmatpush.bf16.msra.mxu2 %v1673_v33 }
 0x198   : > { %1733 = vmatpush.bf16.msra.mxu1 %v1672_v2  ;;  %2594 = vmatpush.bf16.msra.mxu2 %v1672_v2 }
 0x19c   : > { %1734 = vmatpush.bf16.msra.mxu1 %v1671_v59  ;;  %2595 = vmatpush.bf16.msra.mxu2 %v1671_v59 }
 0x19f   : > { %1735 = vmatmul.bf16.vlgmr.msra.gmra.mxu1 %v2579_v31  ;;  %1755 = vmatmul.bf16.vlgmr.msra.gmra.mxu2 %v2583_v51 }
 0x1af   : > { %1740 = vmatmul.bf16.gmra.mxu1 %v2580_v47  ;;  %1760 = vmatmul.bf16.gmra.mxu2 %v2584_v23 }
 0x1bf   : > { %1745 = vmatmul.bf16.gmra.mxu1 %v2581_v6  ;;  %1765 = vmatmul.bf16.gmra.mxu2 %v2585_v43 }
 0x1cf   : > { %1750 = vmatmul.bf16.gmra.mxu1 %v2582_v61  ;;  %1770 = vmatmul.bf16.gmra.mxu2 %v2586_v35 }
 0x21c   : > { %v4257_v50 = vpop.f32.mrf.mxu1 }
 0x222   : > { %v4259_v13 = vpop.f32.mrf.mxu2 }
 0x224   : > { %v4261_v45 = vpop.f32.mrf.mxu1 }
 0x22a   : > { %v4263_v38 = vpop.f32.mrf.mxu2 }
 0x22c   : > { %v4265_v55 = vpop.f32.mrf.mxu1 }
 0x232   : > { %v4267_v7 = vpop.f32.mrf.mxu2 }
 0x234   : > { %v4269_v52 = vpop.f32.mrf.mxu1 }
 0x23a   : > { %v4271_v54 = vpop.f32.mrf.mxu2 }
 0x23c   : > { %v4273_v1 = vpop.f32.mrf.mxu1 }
 0x242   : > { %v4275_v22 = vpop.f32.mrf.mxu2 }
 0x244   : > { %v4277_v14 = vpop.f32.mrf.mxu1 }
 0x24a   : > { %v4279_v32 = vpop.f32.mrf.mxu2 }
 0x24c   : > { %v4281_v63 = vpop.f32.mrf.mxu1 }
 0x252   : > { %v4283_v17 = vpop.f32.mrf.mxu2 }
 0x254   : > { %v4285_v19 = vpop.f32.mrf.mxu1 }
 0x256   : > { %1778 = sbr.rel (%p2561_p6) target bundleno = 809 (0x329), region = 76 }
 0x25a   : > { %v4287_v25 = vpop.f32.mrf.mxu2 }
 0x25b   : > { %v1780_v60 = vlaneseq  ;;  %v1805_v8 = vld [vmem:[#allocation2 + $0x10] sm:$0xff]  ;;  %v1803_v41 = vld [vmem:[#allocation2] sm:$0xff]  ;;  %vm1867_vm7 = vcmask 7168   ;;  %v1806_v23 = vld [vmem:[#allocation2 + $0x18] sm:$0xff] }
 0x25c   : > { %v1807_v33 = vld [vmem:[#allocation2 + $0x20] sm:$0xff]  ;;  %v1804_v6 = vld [vmem:[#allocation2 + $0x8] sm:$0xff] }
 0x25d   : > { %v1781_v10 = vand.u32 127, %v1780_v60  ;;  %v1808_v43 = vld [vmem:[#allocation2 + $0x28] sm:$0xff] }
 0x25f   : > { %vm1784_vm6 = vcmp.lt.s32.totalorder %v1781_v10, 8 }
 0x260   : > { %v1789_v4 = vsel %vm1784_vm6, %v4265_v55, 0.0  ;;  %v1787_v20 = vsel %vm1784_vm6, %v4257_v50, 0.0  ;;  %v1791_v5 = vsel %vm1784_vm6, %v4273_v1, 0.0  ;;  %v1790_v44 = vsel %vm1784_vm6, %v4269_v52, 0.0 }
 0x261   : > { %1823 = vadd.xlane.f32.xlu1 %v1789_v4  ;;  %1819 = vadd.xlane.f32.xlu0 %v1787_v20  ;;  %v1788_v59 = vsel %vm1784_vm6, %v4261_v45, 0.0  ;;  %v1792_v39 = vsel %vm1784_vm6, %v4277_v14, 0.0  ;;  %v1794_v28 = vsel %vm1784_vm6, %v4285_v19, 0.0  ;;  %v1793_v26 = vsel %vm1784_vm6, %v4281_v63, 0.0 }
 0x262   : > { %1827 = vadd.xlane.f32.xlu2 %v1791_v5  ;;  %v1795_v11 = vsel %vm1784_vm6, %v4259_v13, 0.0  ;;  %v1797_v15 = vsel %vm1784_vm6, %v4267_v7, 0.0  ;;  %v1796_v21 = vsel %vm1784_vm6, %v4263_v38, 0.0  ;;  %v1798_v30 = vsel %vm1784_vm6, %v4271_v54, 0.0 }
 0x263   : > { %v1800_v40 = vsel %vm1784_vm6, %v4279_v32, 0.0  ;;  %v1799_v9 = vsel %vm1784_vm6, %v4275_v22, 0.0  ;;  %v1801_v37 = vsel %vm1784_vm6, %v4283_v17, 0.0  ;;  %v1900_v42 = vmul.f32 %v1787_v20, %v1787_v20 }
 0x264   : > { %v1802_v53 = vsel %vm1784_vm6, %v4287_v25, 0.0  ;;  %v1901_v12 = vmul.f32 %v1788_v59, %v1788_v59  ;;  %v1902_v0 = vmul.f32 %v1789_v4, %v1789_v4  ;;  %v1903_v62 = vmul.f32 %v1790_v44, %v1790_v44 }
 0x265   : > { %v1904_v3 = vmul.f32 %v1791_v5, %v1791_v5  ;;  %v1905_v56 = vmul.f32 %v1792_v39, %v1792_v39  ;;  %v1906_v58 = vmul.f32 %v1793_v26, %v1793_v26  ;;  %v1907_v34 = vmul.f32 %v1794_v28, %v1794_v28  ;;  %v1810_v5 = vld [vmem:[#allocation2 + $0x38] sm:$0xff] }
 0x266   : > { %v1908_v48 = vmul.f32 %v1795_v11, %v1795_v11  ;;  %v1909_v16 = vmul.f32 %v1796_v21, %v1796_v21  ;;  %v1910_v46 = vmul.f32 %v1797_v15, %v1797_v15  ;;  %v1911_v57 = vmul.f32 %v1798_v30, %v1798_v30 }
 0x267   : > { %v1912_v24 = vmul.f32 %v1799_v9, %v1799_v9  ;;  %v1913_v49 = vmul.f32 %v1800_v40, %v1800_v40  ;;  %v1914_v36 = vmul.f32 %v1801_v37, %v1801_v37  ;;  %v1915_v27 = vmul.f32 %v1802_v53, %v1802_v53 }
 0x269   : > { %1825 = vadd.xlane.f32.xlu1 %v1790_v44  ;;  %1821 = vadd.xlane.f32.xlu0 %v1788_v59  ;;  %v1809_v44 = vld [vmem:[#allocation2 + $0x30] sm:$0xff]  ;;  %v1811_v59 = vld [vmem:[#allocation2 + $0x40] sm:$0xff] }
 0x26a   : > { %1829 = vadd.xlane.f32.xlu2 %v1792_v39 }
 0x271   : > { %1833 = vadd.xlane.f32.xlu1 %v1794_v28  ;;  %1831 = vadd.xlane.f32.xlu0 %v1793_v26 }
 0x272   : > { %1835 = vadd.xlane.f32.xlu2 %v1795_v11 }
 0x279   : > { %1839 = vadd.xlane.f32.xlu1 %v1797_v15  ;;  %1837 = vadd.xlane.f32.xlu0 %v1796_v21 }
 0x27a   : > { %1841 = vadd.xlane.f32.xlu2 %v1798_v30  ;;  %v1813_v30 = vld [vmem:[#allocation2 + $0x50] sm:$0xff] }
 0x281   : > { %1845 = vadd.xlane.f32.xlu1 %v1800_v40  ;;  %1843 = vadd.xlane.f32.xlu0 %v1799_v9  ;;  %v1812_v40 = vld [vmem:[#allocation2 + $0x48] sm:$0xff]  ;;  %v1814_v9 = vld [vmem:[#allocation2 + $0x58] sm:$0xff] }
 0x282   : > { %1847 = vadd.xlane.f32.xlu2 %v1801_v37 }
 0x289   : > { %1849 = vadd.xlane.f32.xlu0 %v1802_v53  ;;  %1916 = vadd.xlane.f32.xlu1 %v1900_v42 }
 0x28a   : > { %1918 = vadd.xlane.f32.xlu2 %v1901_v12 }
 0x291   : > { %1920 = vadd.xlane.f32.xlu0 %v1902_v0  ;;  %1922 = vadd.xlane.f32.xlu1 %v1903_v62 }
 0x292   : > { %1924 = vadd.xlane.f32.xlu2 %v1904_v3  ;;  %v1816_v3 = vld [vmem:[#allocation2 + $0x68] sm:$0xff] }
 0x299   : > { %1926 = vadd.xlane.f32.xlu0 %v1905_v56  ;;  %1928 = vadd.xlane.f32.xlu1 %v1906_v58  ;;  %v1815_v56 = vld [vmem:[#allocation2 + $0x60] sm:$0xff]  ;;  %v1817_v58 = vld [vmem:[#allocation2 + $0x70] sm:$0xff] }
 0x29a   : > { %1930 = vadd.xlane.f32.xlu2 %v1907_v34 }
 0x2a1   : > { %1932 = vadd.xlane.f32.xlu0 %v1908_v48  ;;  %1934 = vadd.xlane.f32.xlu1 %v1909_v16 }
 0x2a2   : > { %1936 = vadd.xlane.f32.xlu2 %v1910_v46 }
 0x2a9   : > { %1938 = vadd.xlane.f32.xlu0 %v1911_v57  ;;  %1940 = vadd.xlane.f32.xlu1 %v1912_v24 }
 0x2aa   : > { %1942 = vadd.xlane.f32.xlu2 %v1913_v49  ;;  %v1818_v49 = vld [vmem:[#allocation2 + $0x78] sm:$0xff] }
 0x2b1   : > { %1944 = vadd.xlane.f32.xlu0 %v1914_v36  ;;  %1946 = vadd.xlane.f32.xlu1 %v1915_v27  ;;  %v1884_v36 = vld [vmem:[#allocation3] sm:$0xff]  ;;  %v1885_v27 = vld [vmem:[#allocation3 + $0x8] sm:$0xff] }
 0x2d4   : > { %v1824_v18 = vpop.xlane.xlu1 %1823  ;;  %v1820_v29 = vpop.xlane.xlu0 %1819 }
 0x2d5   : > { %v1853_v2 = vadd.f32 %v1824_v18, %v1805_v8  ;;  %v1851_v31 = vadd.f32 %v1820_v29, %v1803_v41  ;;  %v1828_v51 = vpop.xlane.xlu2 %1827 }
 0x2d6   : > { %v1855_v47 = vadd.f32 %v1828_v51, %v1807_v33  ;;  %v1887_v51 = vld [vmem:[#allocation3 + $0x18] sm:$0xff] }
 0x2d7   : > { %1870 = vst.msk [vmem:[#allocation2 + $0x10] sm:$0xff] %vm1867_vm7, %v1853_v2 }
 0x2d8   : > { %1868 = vst.msk [vmem:[#allocation2] sm:$0xff] %vm1867_vm7, %v1851_v31  ;;  %v1886_v31 = vld [vmem:[#allocation3 + $0x10] sm:$0xff] }
 0x2d9   : > { %1872 = vst.msk [vmem:[#allocation2 + $0x20] sm:$0xff] %vm1867_vm7, %v1855_v47  ;;  %v1888_v47 = vld [vmem:[#allocation3 + $0x20] sm:$0xff] }
 0x2dc   : > { %v1826_v61 = vpop.xlane.xlu1 %1825  ;;  %v1822_v35 = vpop.xlane.xlu0 %1821 }
 0x2dd   : > { %v1854_v60 = vadd.f32 %v1826_v61, %v1806_v23  ;;  %v1852_v10 = vadd.f32 %v1822_v35, %v1804_v6  ;;  %v1830_v4 = vpop.xlane.xlu2 %1829 }
 0x2de   : > { %v1856_v20 = vadd.f32 %v1830_v4, %v1808_v43  ;;  %v1890_v4 = vld [vmem:[#allocation3 + $0x30] sm:$0xff] }
 0x2df   : > { %1871 = vst.msk [vmem:[#allocation2 + $0x18] sm:$0xff] %vm1867_vm7, %v1854_v60 }
 0x2e0   : > { %1869 = vst.msk [vmem:[#allocation2 + $0x8] sm:$0xff] %vm1867_vm7, %v1852_v10  ;;  %v1889_v10 = vld [vmem:[#allocation3 + $0x28] sm:$0xff] }
 0x2e1   : > { %1873 = vst.msk [vmem:[#allocation2 + $0x28] sm:$0xff] %vm1867_vm7, %v1856_v20  ;;  %v1891_v20 = vld [vmem:[#allocation3 + $0x38] sm:$0xff] }
 0x2e4   : > { %v1834_v39 = vpop.xlane.xlu1 %1833  ;;  %v1832_v28 = vpop.xlane.xlu0 %1831 }
 0x2e5   : > { %v1858_v26 = vadd.f32 %v1834_v39, %v1810_v5  ;;  %v1857_v11 = vadd.f32 %v1832_v28, %v1809_v44  ;;  %v1836_v15 = vpop.xlane.xlu2 %1835 }
 0x2e6   : > { %v1859_v21 = vadd.f32 %v1836_v15, %v1811_v59  ;;  %v1893_v15 = vld [vmem:[#allocation3 + $0x48] sm:$0xff] }
 0x2e7   : > { %1875 = vst.msk [vmem:[#allocation2 + $0x38] sm:$0xff] %vm1867_vm7, %v1858_v26 }
 0x2e8   : > { %1874 = vst.msk [vmem:[#allocation2 + $0x30] sm:$0xff] %vm1867_vm7, %v1857_v11  ;;  %v1892_v11 = vld [vmem:[#allocation3 + $0x40] sm:$0xff] }
 0x2e9   : > { %1876 = vst.msk [vmem:[#allocation2 + $0x40] sm:$0xff] %vm1867_vm7, %v1859_v21  ;;  %v1894_v21 = vld [vmem:[#allocation3 + $0x50] sm:$0xff] }
 0x2ec   : > { %v1840_v37 = vpop.xlane.xlu1 %1839  ;;  %v1838_v42 = vpop.xlane.xlu0 %1837 }
 0x2ed   : > { %v1861_v53 = vadd.f32 %v1840_v37, %v1813_v30  ;;  %v1860_v12 = vadd.f32 %v1838_v42, %v1812_v40  ;;  %v1842_v0 = vpop.xlane.xlu2 %1841 }
 0x2ee   : > { %v1862_v62 = vadd.f32 %v1842_v0, %v1814_v9  ;;  %v1896_v0 = vld [vmem:[#allocation3 + $0x60] sm:$0xff] }
 0x2ef   : > { %1878 = vst.msk [vmem:[#allocation2 + $0x50] sm:$0xff] %vm1867_vm7, %v1861_v53 }
 0x2f0   : > { %1877 = vst.msk [vmem:[#allocation2 + $0x48] sm:$0xff] %vm1867_vm7, %v1860_v12  ;;  %v1895_v12 = vld [vmem:[#allocation3 + $0x58] sm:$0xff] }
 0x2f1   : > { %1879 = vst.msk [vmem:[#allocation2 + $0x58] sm:$0xff] %vm1867_vm7, %v1862_v62  ;;  %v1897_v62 = vld [vmem:[#allocation3 + $0x68] sm:$0xff] }
 0x2f4   : > { %v1846_v34 = vpop.xlane.xlu1 %1845  ;;  %v1844_v48 = vpop.xlane.xlu0 %1843 }
 0x2f5   : > { %v1864_v16 = vadd.f32 %v1846_v34, %v1816_v3  ;;  %v1863_v46 = vadd.f32 %v1844_v48, %v1815_v56  ;;  %v1848_v57 = vpop.xlane.xlu2 %1847 }
 0x2f6   : > { %v1865_v24 = vadd.f32 %v1848_v57, %v1817_v58  ;;  %v1899_v57 = vld [vmem:[#allocation3 + $0x78] sm:$0xff] }
 0x2f7   : > { %1881 = vst.msk [vmem:[#allocation2 + $0x68] sm:$0xff] %vm1867_vm7, %v1864_v16 }
 0x2f8   : > { %1880 = vst.msk [vmem:[#allocation2 + $0x60] sm:$0xff] %vm1867_vm7, %v1863_v46  ;;  %v1898_v46 = vld [vmem:[#allocation3 + $0x70] sm:$0xff] }
 0x2f9   : > { %1882 = vst.msk [vmem:[#allocation2 + $0x70] sm:$0xff] %vm1867_vm7, %v1865_v24 }
 0x2fc   : > { %v1850_v8 = vpop.xlane.xlu0 %1849  ;;  %v1917_v41 = vpop.xlane.xlu1 %1916 }
 0x2fd   : > { %v1866_v33 = vadd.f32 %v1850_v8, %v1818_v49  ;;  %v1948_v18 = vadd.f32 %v1917_v41, %v1884_v36  ;;  %v1919_v29 = vpop.xlane.xlu2 %1918 }
 0x2fe   : > { %v1949_v2 = vadd.f32 %v1919_v29, %v1885_v27 }
 0x2ff   : > { %1883 = vst.msk [vmem:[#allocation2 + $0x78] sm:$0xff] %vm1867_vm7, %v1866_v33 }
 0x300   : > { %1964 = vst.msk [vmem:[#allocation3] sm:$0xff] %vm1867_vm7, %v1948_v18 }
 0x301   : > { %1965 = vst.msk [vmem:[#allocation3 + $0x8] sm:$0xff] %vm1867_vm7, %v1949_v2 }
 0x304   : > { %v1921_v23 = vpop.xlane.xlu0 %1920  ;;  %v1923_v6 = vpop.xlane.xlu1 %1922 }
 0x305   : > { %v1950_v43 = vadd.f32 %v1921_v23, %v1886_v31  ;;  %v1951_v61 = vadd.f32 %v1923_v6, %v1887_v51  ;;  %v1925_v35 = vpop.xlane.xlu2 %1924 }
 0x306   : > { %v1952_v60 = vadd.f32 %v1925_v35, %v1888_v47 }
 0x307   : > { %1966 = vst.msk [vmem:[#allocation3 + $0x10] sm:$0xff] %vm1867_vm7, %v1950_v43 }
 0x308   : > { %1967 = vst.msk [vmem:[#allocation3 + $0x18] sm:$0xff] %vm1867_vm7, %v1951_v61 }
 0x309   : > { %1968 = vst.msk [vmem:[#allocation3 + $0x20] sm:$0xff] %vm1867_vm7, %v1952_v60 }
 0x30c   : > { %v1927_v5 = vpop.xlane.xlu0 %1926  ;;  %v1929_v44 = vpop.xlane.xlu1 %1928 }
 0x30d   : > { %v1953_v59 = vadd.f32 %v1927_v5, %v1889_v10  ;;  %v1954_v39 = vadd.f32 %v1929_v44, %v1890_v4  ;;  %v1931_v28 = vpop.xlane.xlu2 %1930 }
 0x30e   : > { %v1955_v26 = vadd.f32 %v1931_v28, %v1891_v20 }
 0x30f   : > { %1969 = vst.msk [vmem:[#allocation3 + $0x28] sm:$0xff] %vm1867_vm7, %v1953_v59 }
 0x310   : > { %1970 = vst.msk [vmem:[#allocation3 + $0x30] sm:$0xff] %vm1867_vm7, %v1954_v39 }
 0x311   : > { %1971 = vst.msk [vmem:[#allocation3 + $0x38] sm:$0xff] %vm1867_vm7, %v1955_v26 }
 0x314   : > { %v1933_v30 = vpop.xlane.xlu0 %1932  ;;  %v1935_v40 = vpop.xlane.xlu1 %1934 }
 0x315   : > { %v1956_v9 = vadd.f32 %v1933_v30, %v1892_v11  ;;  %v1957_v37 = vadd.f32 %v1935_v40, %v1893_v15  ;;  %v1937_v42 = vpop.xlane.xlu2 %1936 }
 0x316   : > { %v1958_v53 = vadd.f32 %v1937_v42, %v1894_v21 }
 0x317   : > { %1972 = vst.msk [vmem:[#allocation3 + $0x40] sm:$0xff] %vm1867_vm7, %v1956_v9 }
 0x318   : > { %1973 = vst.msk [vmem:[#allocation3 + $0x48] sm:$0xff] %vm1867_vm7, %v1957_v37 }
 0x319   : > { %1974 = vst.msk [vmem:[#allocation3 + $0x50] sm:$0xff] %vm1867_vm7, %v1958_v53 }
 0x31c   : > { %v1939_v3 = vpop.xlane.xlu0 %1938  ;;  %v1941_v56 = vpop.xlane.xlu1 %1940 }
 0x31d   : > { %v1959_v58 = vadd.f32 %v1939_v3, %v1895_v12  ;;  %v1960_v34 = vadd.f32 %v1941_v56, %v1896_v0  ;;  %v1943_v48 = vpop.xlane.xlu2 %1942 }
 0x31e   : > { %v1961_v16 = vadd.f32 %v1943_v48, %v1897_v62 }
 0x31f   : > { %1975 = vst.msk [vmem:[#allocation3 + $0x58] sm:$0xff] %vm1867_vm7, %v1959_v58 }
 0x320   : > { %1976 = vst.msk [vmem:[#allocation3 + $0x60] sm:$0xff] %vm1867_vm7, %v1960_v34 }
 0x321   : > { %1977 = vst.msk [vmem:[#allocation3 + $0x68] sm:$0xff] %vm1867_vm7, %v1961_v16 }
 0x324   : > { %v1945_v24 = vpop.xlane.xlu0 %1944  ;;  %v1947_v49 = vpop.xlane.xlu1 %1946 }
 0x325   : > { %v1962_v36 = vadd.f32 %v1945_v24, %v1898_v46  ;;  %v1963_v27 = vadd.f32 %v1947_v49, %v1899_v57 }
 0x327   : > { %1978 = vst.msk [vmem:[#allocation3 + $0x70] sm:$0xff] %vm1867_vm7, %v1962_v36 }
 0x328   : > { %1979 = vst.msk [vmem:[#allocation3 + $0x78] sm:$0xff] %vm1867_vm7, %v1963_v27 }
 0x329 PF: > { %p2562_p7 = scmp.ne.s32.totalorder %s2711_s19, 1 }
 0x32b   : > { %1982 = sbr.rel (%p2562_p7) target bundleno = 1105 (0x451), region = 80 }
 0x330   : > { %v1987_v8 = vld [vmem:[#allocation6 + $0x20] sm:$0xff]  ;;  %v1985_v41 = vld [vmem:[#allocation6 + $0x10] sm:$0xff]  ;;  %v2723_v18 = vmov 0   ;;  %v1988_v29 = vld [vmem:[#allocation6 + $0x28] sm:$0xff] }
 0x331   : > { %v1983_v33 = vld [vmem:[#allocation6] sm:$0xff]  ;;  %2692 = vset.pattern.permute.xlu2 %v2723_v18  ;;  %2691 = vset.pattern.permute.xlu1 %v2723_v18  ;;  %v1986_v2 = vld [vmem:[#allocation6 + $0x18] sm:$0xff]  ;;  %v1984_v31 = vld [vmem:[#allocation6 + $0x8] sm:$0xff] }
 0x332   : > { %2690 = vset.pattern.permute.xlu0 %v2723_v18  ;;  %2021 = vperm.xlu2 %2692, %v1987_v8   ;;  %v1991_v51 = vld [vmem:[#allocation6 + $0x40] sm:$0xff]  ;;  %v1990_v47 = vld [vmem:[#allocation6 + $0x38] sm:$0xff]  ;;  %v1989_v23 = vld [vmem:[#allocation6 + $0x30] sm:$0xff] }
 0x333   : > { %2011 = vperm.xlu1 %2691, %v1985_v41   ;;  %2001 = vperm.xlu0 %2690, %v1983_v33   ;;  %v1994_v6 = vld [vmem:[#allocation6 + $0x58] sm:$0xff]  ;;  %v1993_v43 = vld [vmem:[#allocation6 + $0x50] sm:$0xff]  ;;  %v1992_v61 = vld [vmem:[#allocation6 + $0x48] sm:$0xff] }
 0x334   : > { %v1997_v35 = vld [vmem:[#allocation6 + $0x70] sm:$0xff]  ;;  %v1996_v60 = vld [vmem:[#allocation6 + $0x68] sm:$0xff]  ;;  %v1995_v10 = vld [vmem:[#allocation6 + $0x60] sm:$0xff] }
 0x335   : > { %v2096_v4 = vld [vmem:[#allocation7 + $0x8] sm:$0xff]  ;;  %v2095_v20 = vld [vmem:[#allocation7] sm:$0xff]  ;;  %v1998_v5 = vld [vmem:[#allocation6 + $0x78] sm:$0xff] }
 0x336   : > { %v2099_v44 = vld [vmem:[#allocation7 + $0x20] sm:$0xff]  ;;  %v2098_v59 = vld [vmem:[#allocation7 + $0x18] sm:$0xff]  ;;  %v2097_v39 = vld [vmem:[#allocation7 + $0x10] sm:$0xff] }
 0x337   : > { %v2102_v28 = vld [vmem:[#allocation7 + $0x38] sm:$0xff]  ;;  %v2101_v26 = vld [vmem:[#allocation7 + $0x30] sm:$0xff]  ;;  %v2100_v11 = vld [vmem:[#allocation7 + $0x28] sm:$0xff] }
 0x338   : > { %v2105_v15 = vld [vmem:[#allocation7 + $0x50] sm:$0xff]  ;;  %v2104_v21 = vld [vmem:[#allocation7 + $0x48] sm:$0xff]  ;;  %v2103_v30 = vld [vmem:[#allocation7 + $0x40] sm:$0xff] }
 0x339   : > { %v2108_v40 = vld [vmem:[#allocation7 + $0x68] sm:$0xff]  ;;  %v2107_v9 = vld [vmem:[#allocation7 + $0x60] sm:$0xff]  ;;  %v2106_v37 = vld [vmem:[#allocation7 + $0x58] sm:$0xff] }
 0x33a   : > { %2026 = vperm.xlu2 %2692, %v1988_v29   ;;  %v2256_v42 = vld [vmem:[%s4482_s3 + $0x8] sm:$0xff]  ;;  %v2255_v53 = vld [vmem:[%s4482_s3] sm:$0xff]  ;;  %v2109_v12 = vld [vmem:[#allocation7 + $0x70] sm:$0xff] }
 0x33b   : > { %2016 = vperm.xlu1 %2691, %v1986_v2   ;;  %2006 = vperm.xlu0 %2690, %v1984_v31   ;;  %v2259_v0 = vld [vmem:[%s4482_s3 + $0x20] sm:$0xff]  ;;  %v2258_v62 = vld [vmem:[%s4482_s3 + $0x18] sm:$0xff]  ;;  %v2257_v3 = vld [vmem:[%s4482_s3 + $0x10] sm:$0xff] }
 0x33c   : > { %v2262_v58 = vld [vmem:[%s4482_s3 + $0x38] sm:$0xff]  ;;  %v2261_v34 = vld [vmem:[%s4482_s3 + $0x30] sm:$0xff]  ;;  %v2260_v48 = vld [vmem:[%s4482_s3 + $0x28] sm:$0xff] }
 0x33d   : > { %v2265_v46 = vld [vmem:[%s4482_s3 + $0x50] sm:$0xff]  ;;  %v2264_v57 = vld [vmem:[%s4482_s3 + $0x48] sm:$0xff]  ;;  %v2263_v24 = vld [vmem:[%s4482_s3 + $0x40] sm:$0xff] }
 0x33e   : > { %v2110_v36 = vld [vmem:[#allocation7 + $0x78] sm:$0xff]  ;;  %v2267_v27 = vld [vmem:[%s4482_s3 + $0x60] sm:$0xff]  ;;  %v2269_v2 = vld [vmem:[%s4482_s3 + $0x70] sm:$0xff] }
 0x33f   : > { %v2266_v8 = vld [vmem:[%s4482_s3 + $0x58] sm:$0xff]  ;;  %v2268_v31 = vld [vmem:[%s4482_s3 + $0x68] sm:$0xff] }
 0x340   : > { %v2270_v29 = vld [vmem:[%s4482_s3 + $0x78] sm:$0xff] }
 0x342   : > { %2041 = vperm.xlu2 %2692, %v1991_v51  }
 0x343   : > { %2036 = vperm.xlu1 %2691, %v1990_v47   ;;  %2031 = vperm.xlu0 %2690, %v1989_v23  }
 0x34a   : > { %2056 = vperm.xlu2 %2692, %v1994_v6   ;;  %v2388_v6 = vld [vmem:[#allocation8] sm:$0x1] }
 0x34b   : > { %2051 = vperm.xlu1 %2691, %v1993_v43   ;;  %2046 = vperm.xlu0 %2690, %v1992_v61  }
 0x352   : > { %2071 = vperm.xlu2 %2692, %v1997_v35  }
 0x353   : > { %2066 = vperm.xlu1 %2691, %v1996_v60   ;;  %2061 = vperm.xlu0 %2690, %v1995_v10  }
 0x35a   : > { %2118 = vperm.xlu2 %2692, %v2096_v4  }
 0x35b   : > { %2113 = vperm.xlu1 %2691, %v2095_v20   ;;  %2076 = vperm.xlu0 %2690, %v1998_v5  }
 0x362   : > { %2133 = vperm.xlu2 %2692, %v2099_v44  }
 0x363   : > { %2128 = vperm.xlu1 %2691, %v2098_v59   ;;  %2123 = vperm.xlu0 %2690, %v2097_v39  }
 0x36a   : > { %2148 = vperm.xlu2 %2692, %v2102_v28  }
 0x36b   : > { %2143 = vperm.xlu1 %2691, %v2101_v26   ;;  %2138 = vperm.xlu0 %2690, %v2100_v11  }
 0x372   : > { %2163 = vperm.xlu2 %2692, %v2105_v15  }
 0x373   : > { %2158 = vperm.xlu1 %2691, %v2104_v21   ;;  %2153 = vperm.xlu0 %2690, %v2103_v30  }
 0x37a   : > { %2178 = vperm.xlu2 %2692, %v2108_v40  }
 0x37b   : > { %2173 = vperm.xlu1 %2691, %v2107_v9   ;;  %2168 = vperm.xlu0 %2690, %v2106_v37  }
 0x382   : > { %2278 = vperm.xlu2 %2692, %v2256_v42  }
 0x383   : > { %2273 = vperm.xlu1 %2691, %v2255_v53   ;;  %2183 = vperm.xlu0 %2690, %v2109_v12  }
 0x38a   : > { %2293 = vperm.xlu2 %2692, %v2259_v0  }
 0x38b   : > { %2288 = vperm.xlu1 %2691, %v2258_v62   ;;  %2283 = vperm.xlu0 %2690, %v2257_v3  }
 0x38c   : > { %v4370_v56 = vpop.permute.xlu2 %2021 }
 0x392   : > { %2308 = vperm.xlu2 %2692, %v2262_v58  }
 0x393   : > { %2303 = vperm.xlu1 %2691, %v2261_v34   ;;  %2298 = vperm.xlu0 %2690, %v2260_v48  }
 0x394   : > { %v4381_v16 = vpop.permute.xlu2 %2026 }
 0x39a   : > { %2323 = vperm.xlu2 %2692, %v2265_v46  }
 0x39b   : > { %2318 = vperm.xlu1 %2691, %v2264_v57   ;;  %2313 = vperm.xlu0 %2690, %v2263_v24  }
 0x39c   : > { %v4392_v49 = vpop.permute.xlu2 %2041 }
 0x3a2   : > { %2188 = vperm.xlu2 %2692, %v2110_v36  }
 0x3a3   : > { %2333 = vperm.xlu1 %2691, %v2267_v27   ;;  %2328 = vperm.xlu0 %2690, %v2266_v8  }
 0x3a4   : > { %v4400_v18 = vpop.permute.xlu2 %2056 }
 0x3a5   : > { %v2012_v41 = vpop.permute.xlu1 %2011  ;;  %v2002_v33 = vpop.permute.xlu0 %2001 }
 0x3a6   : > { %v2079_v37 = vmul.f32 %v2002_v33, %v4257_v50  ;;  %v2081_v48 = vmul.f32 %v2012_v41, %v4265_v55  ;;  %v2084_v55 = vmul.f32 %v4381_v16, %v4277_v14 }
 0x3aa   : > { %2348 = vperm.xlu2 %2692, %v2270_v29   ;;  %v2083_v29 = vmul.f32 %v4370_v56, %v4273_v1 }
 0x3ab   : > { %2343 = vperm.xlu1 %2691, %v2269_v2   ;;  %2338 = vperm.xlu0 %2690, %v2268_v31  }
 0x3ac   : > { %v4411_v23 = vpop.permute.xlu2 %2071 }
 0x3ad   : > { %v2017_v51 = vpop.permute.xlu1 %2016  ;;  %v2007_v47 = vpop.permute.xlu0 %2006 }
 0x3ae   : > { %v2080_v42 = vmul.f32 %v2007_v47, %v4261_v45  ;;  %v2082_v46 = vmul.f32 %v2017_v51, %v4269_v52 }
 0x3b3   : > { %2391 = vperm.xlu0 %2690, %v2388_v6  }
 0x3b4   : > { %v2119_v35 = vpop.permute.xlu2 %2118 }
 0x3b5   : > { %v2037_v43 = vpop.permute.xlu1 %2036  ;;  %v2032_v61 = vpop.permute.xlu0 %2031  ;;  %v2192_v12 = vadd.f32 %v2119_v35, %v2080_v42 }
 0x3b6   : > { %v2085_v41 = vmul.f32 %v2032_v61, %v4281_v63  ;;  %v2086_v1 = vmul.f32 %v2037_v43, %v4285_v19  ;;  %v2087_v63 = vmul.f32 %v4392_v49, %v4259_v13 }
 0x3b7   : > { %v2224_v58 = vmul.f32 0.2, %v2192_v12  ;;  %vm2208_vm8 = vcmp.gt.f32.partialorder %v2192_v12, 0.0 }
 0x3b9   : > { %v2240_v24 = vsel %vm2208_vm8, %v2192_v12, %v2224_v58 }
 0x3bc   : > { %v2134_v4 = vpop.permute.xlu2 %2133 }
 0x3bd   : > { %v4413_v60 = vpop.permute.xlu1 %2051  ;;  %v4415_v10 = vpop.permute.xlu0 %2046  ;;  %v2195_v47 = vadd.f32 %v2134_v4, %v2083_v29  ;;  %v2090_v29 = vmul.f32 %v4400_v18, %v4271_v54 }
 0x3be   : > { %v2088_v19 = vmul.f32 %v4415_v10, %v4263_v38 }
 0x3bf   : > { %v2227_v51 = vmul.f32 0.2, %v2195_v47  ;;  %vm2211_vm13 = vcmp.gt.f32.partialorder %v2195_v47, 0.0 }
 0x3c1   : > { %v2243_v16 = vsel %vm2211_vm13, %v2195_v47, %v2227_v51 }
 0x3c4   : > { %v2149_v39 = vpop.permute.xlu2 %2148 }
 0x3c5   : > { %v4417_v20 = vpop.permute.xlu1 %2066  ;;  %v4419_v5 = vpop.permute.xlu0 %2061 }
 0x3cc   : > { %v4423_v11 = vpop.permute.xlu2 %2163 }
 0x3cd   : > { %v2114_v44 = vpop.permute.xlu1 %2113  ;;  %v4421_v59 = vpop.permute.xlu0 %2076 }
 0x3ce   : > { %v2191_v0 = vadd.f32 %v2114_v44, %v2079_v37 }
 0x3d0   : > { %v2223_v34 = vmul.f32 0.2, %v2191_v0  ;;  %vm2207_vm9 = vcmp.gt.f32.partialorder %v2191_v0, 0.0 }
 0x3d2   : > { %v2239_v36 = vsel %vm2207_vm9, %v2191_v0, %v2223_v34  ;;  %v2198_v0 = vadd.f32 %v2149_v39, %v2086_v1 }
 0x3d4   : > { %v4425_v30 = vpop.permute.xlu2 %2178  ;;  %v2230_v43 = vmul.f32 0.2, %v2198_v0  ;;  %vm2214_vm1 = vcmp.gt.f32.partialorder %v2198_v0, 0.0 }
 0x3d5   : > { %v2129_v28 = vpop.permute.xlu1 %2128  ;;  %v2124_v26 = vpop.permute.xlu0 %2123 }
 0x3d6   : > { %v2193_v57 = vadd.f32 %v2124_v26, %v2081_v48  ;;  %v2194_v2 = vadd.f32 %v2129_v28, %v2082_v46 }
 0x3d8   : > { %v2225_v6 = vmul.f32 0.2, %v2193_v57  ;;  %vm2209_vm10 = vcmp.gt.f32.partialorder %v2193_v57, 0.0  ;;  %v2226_v52 = vmul.f32 0.2, %v2194_v2  ;;  %vm2210_vm12 = vcmp.gt.f32.partialorder %v2194_v2, 0.0 }
 0x3da   : > { %v2241_v26 = vsel %vm2209_vm10, %v2193_v57, %v2225_v6  ;;  %v2242_v4 = vsel %vm2210_vm12, %v2194_v2, %v2226_v52 }
 0x3dc   : > { %v2279_v53 = vpop.permute.xlu2 %2278 }
 0x3dd   : > { %v2144_v15 = vpop.permute.xlu1 %2143  ;;  %v2139_v21 = vpop.permute.xlu0 %2138  ;;  %v2352_v27 = vmul.f32 %v2279_v53, %v2240_v24  ;;  %v2089_v24 = vmul.f32 %v4413_v60, %v4267_v7  ;;  %v2091_v7 = vmul.f32 %v4419_v5, %v4275_v22  ;;  %v2092_v22 = vmul.f32 %v4417_v20, %v4279_v32 }
 0x3de   : > { %v2196_v35 = vadd.f32 %v2139_v21, %v2084_v55  ;;  %v2197_v56 = vadd.f32 %v2144_v15, %v2085_v41 }
 0x3e0   : > { %v2228_v14 = vmul.f32 0.2, %v2196_v35  ;;  %vm2212_vm14 = vcmp.gt.f32.partialorder %v2196_v35, 0.0  ;;  %v2229_v61 = vmul.f32 0.2, %v2197_v56  ;;  %vm2213_vm15 = vcmp.gt.f32.partialorder %v2197_v56, 0.0 }
 0x3e2   : > { %v2244_v46 = vsel %vm2212_vm14, %v2196_v35, %v2228_v14 }
 0x3e4   : > { %v2294_v8 = vpop.permute.xlu2 %2293 }
 0x3e5   : > { %v4427_v40 = vpop.permute.xlu1 %2158  ;;  %v2154_v9 = vpop.permute.xlu0 %2153  ;;  %v2355_v58 = vmul.f32 %v2294_v8, %v2243_v16 }
 0x3e6   : > { %v2199_v15 = vadd.f32 %v2154_v9, %v2087_v63 }
 0x3e8   : > { %v2231_v8 = vmul.f32 0.2, %v2199_v15  ;;  %vm2215_vm2 = vcmp.gt.f32.partialorder %v2199_v15, 0.0 }
 0x3ec   : > { %v2309_v28 = vpop.permute.xlu2 %2308 }
 0x3ed   : > { %v4431_v62 = vpop.permute.xlu1 %2173  ;;  %v4433_v3 = vpop.permute.xlu0 %2168 }
 0x3ee   : > { %v2203_v52 = vadd.f32 %v4431_v62, %v2091_v7  ;;  %v2204_v62 = vadd.f32 %v4425_v30, %v2092_v22 }
 0x3f0   : > { %v2235_v5 = vmul.f32 0.2, %v2203_v52  ;;  %vm2219_vm5 = vcmp.gt.f32.partialorder %v2203_v52, 0.0  ;;  %v2236_v14 = vmul.f32 0.2, %v2204_v62  ;;  %vm2220_vm11 = vcmp.gt.f32.partialorder %v2204_v62, 0.0 }
 0x3f2   : > { %v2252_v30 = vsel %vm2220_vm11, %v2204_v62, %v2236_v14 }
 0x3f4   : > { %v2324_v10 = vpop.permute.xlu2 %2323 }
 0x3f5   : > { %v2274_v50 = vpop.permute.xlu1 %2273  ;;  %v4437_v45 = vpop.permute.xlu0 %2183 }
 0x3f6   : > { %v2351_v33 = vmul.f32 %v2274_v50, %v2239_v36  ;;  %v2200_v50 = vadd.f32 %v4427_v40, %v2088_v19  ;;  %v2245_v36 = vsel %vm2213_vm15, %v2197_v56, %v2229_v61  ;;  %v2202_v40 = vadd.f32 %v4433_v3, %v2090_v29 }
 0x3f8   : > { %v2367_v31 = vadd.f32 %v2352_v27, %v2351_v33  ;;  %v2201_v27 = vadd.f32 %v4423_v11, %v2089_v24  ;;  %v2246_v33 = vsel %vm2214_vm1, %v2198_v0, %v2230_v43  ;;  %v2232_v2 = vmul.f32 0.2, %v2200_v50 }
 0x3f9   : > { %v2358_v38 = vmul.f32 %v2309_v28, %v2246_v33  ;;  %vm2216_vm3 = vcmp.gt.f32.partialorder %v2200_v50, 0.0  ;;  %v2247_v11 = vsel %vm2215_vm2, %v2199_v15, %v2231_v8  ;;  %v2234_v54 = vmul.f32 0.2, %v2202_v40 }
 0x3fa   : > { %v2233_v60 = vmul.f32 0.2, %v2201_v27  ;;  %vm2217_vm0 = vcmp.gt.f32.partialorder %v2201_v27, 0.0  ;;  %v2248_v41 = vsel %vm2216_vm3, %v2200_v50, %v2232_v2  ;;  %vm2218_vm4 = vcmp.gt.f32.partialorder %v2202_v40, 0.0 }
 0x3fb   : > { %v2250_v56 = vsel %vm2218_vm4, %v2202_v40, %v2234_v54  ;;  %v2251_v0 = vsel %vm2219_vm5, %v2203_v52, %v2235_v5 }
 0x3fc   : > { %v2249_v18 = vsel %vm2217_vm0, %v2201_v27, %v2233_v60  ;;  %v2189_v3 = vpop.permute.xlu2 %2188 }
 0x3fd   : > { %v2289_v44 = vpop.permute.xlu1 %2288  ;;  %v2284_v37 = vpop.permute.xlu0 %2283 }
 0x3fe   : > { %v2353_v42 = vmul.f32 %v2284_v37, %v2241_v26  ;;  %v2354_v53 = vmul.f32 %v2289_v44, %v2242_v4  ;;  %v2361_v44 = vmul.f32 %v2324_v10, %v2249_v18 }
 0x400   : > { %v2368_v12 = vadd.f32 %v2367_v31, %v2353_v42  ;;  %v2093_v42 = vmul.f32 %v4411_v23, %v4283_v17 }
 0x402   : > { %v2369_v34 = vadd.f32 %v2368_v12, %v2354_v53  ;;  %v2094_v53 = vmul.f32 %v4421_v59, %v4287_v25  ;;  %v2205_v12 = vadd.f32 %v4437_v45, %v2093_v42 }
 0x404   : > { %v2370_v21 = vadd.f32 %v2369_v34, %v2355_v58  ;;  %v2206_v16 = vadd.f32 %v2189_v3, %v2094_v53  ;;  %v2237_v34 = vmul.f32 0.2, %v2205_v12  ;;  %vm2221_vm6 = vcmp.gt.f32.partialorder %v2205_v12, 0.0 }
 0x405   : > { %v2304_v48 = vpop.permute.xlu1 %2303  ;;  %v2299_v57 = vpop.permute.xlu0 %2298 }
 0x406   : > { %v2356_v39 = vmul.f32 %v2299_v57, %v2244_v46  ;;  %v2357_v13 = vmul.f32 %v2304_v48, %v2245_v36  ;;  %v2238_v17 = vmul.f32 0.2, %v2206_v16  ;;  %vm2222_vm7 = vcmp.gt.f32.partialorder %v2206_v16, 0.0 }
 0x407   : > { %v2253_v19 = vsel %vm2221_vm6, %v2205_v12, %v2237_v34 }
 0x408   : > { %v2371_v49 = vadd.f32 %v2370_v21, %v2356_v39  ;;  %v2349_v21 = vpop.permute.xlu2 %2348  ;;  %v2254_v45 = vsel %vm2222_vm7, %v2206_v16, %v2238_v17 }
 0x409   : > { %v2366_v43 = vmul.f32 %v2349_v21, %v2254_v45 }
 0x40a   : > { %v2372_v9 = vadd.f32 %v2371_v49, %v2357_v13 }
 0x40c   : > { %v2373_v31 = vadd.f32 %v2372_v9, %v2358_v38 }
 0x40d   : > { %v2319_v47 = vpop.permute.xlu1 %2318  ;;  %v2314_v6 = vpop.permute.xlu0 %2313 }
 0x40e   : > { %v2359_v55 = vmul.f32 %v2314_v6, %v2247_v11  ;;  %v2360_v51 = vmul.f32 %v2319_v47, %v2248_v41 }
 0x410   : > { %v2374_v35 = vadd.f32 %v2373_v31, %v2359_v55 }
 0x412   : > { %v2375_v26 = vadd.f32 %v2374_v35, %v2360_v51 }
 0x414   : > { %v2376_v37 = vadd.f32 %v2375_v26, %v2361_v44 }
 0x415   : > { %v2334_v1 = vpop.permute.xlu1 %2333  ;;  %v2329_v4 = vpop.permute.xlu0 %2328 }
 0x416   : > { %v2362_v28 = vmul.f32 %v2329_v4, %v2250_v56  ;;  %v2363_v32 = vmul.f32 %v2334_v1, %v2251_v0 }
 0x418   : > { %v2377_v20 = vadd.f32 %v2376_v37, %v2362_v28 }
 0x41a   : > { %v2378_v58 = vadd.f32 %v2377_v20, %v2363_v32 }
 0x41d   : > { %v2344_v23 = vpop.permute.xlu1 %2343  ;;  %v2339_v63 = vpop.permute.xlu0 %2338 }
 0x41e   : > { %v2364_v61 = vmul.f32 %v2339_v63, %v2252_v30  ;;  %v2365_v25 = vmul.f32 %v2344_v23, %v2253_v19 }
 0x420   : > { %v2379_v59 = vadd.f32 %v2378_v58, %v2364_v61 }
 0x422   : > { %v2380_v15 = vadd.f32 %v2379_v59, %v2365_v25 }
 0x424   : > { %v2381_v48 = vadd.f32 %v2380_v15, %v2366_v43 }
 0x425   : > { %v2392_v50 = vpop.permute.xlu0 %2391 }
 0x426   : > { %v2382_v46 = vrot.slane %v2381_v48, 4  ;;  %v2394_v49 = vperm.slane %v2392_v50, 0 }
 0x428   : > { %v2383_v57 = vadd.f32 %v2382_v46, %v2381_v48 }
 0x42a   : > { %v2384_v39 = vrot.slane %v2383_v57, 2 }
 0x42c   : > { %v2385_v24 = vadd.f32 %v2384_v39, %v2383_v57 }
 0x42e   : > { %v2386_v36 = vrot.slane %v2385_v24, 1 }
 0x430   : > { %v2387_v13 = vadd.f32 %v2386_v36, %v2385_v24 }
 0x432   : > { %v2395_v27 = vadd.f32 %v2394_v49, %v2387_v13 }
 0x434   : > { %v2563_v8 = vmul.f32 -1.442695, %v2395_v27 }
 0x436   : > { %2693 = vpow2.f32 %v2563_v8 }
 0x43c   : > { %v2694_v33 = vpop.eup %2693 }
 0x43d   : > { %v2399_v38 = vadd.f32 1.0, %v2694_v33 }
 0x43f   : > { %2695 = vrcp.f32 %v2399_v38  ;;  %v2411_v2 = vand.u32 2147483648, %v2399_v38  ;;  %v2409_v7 = vand.u32 2147483647, %v2399_v38  ;;  %vm2405_vm9 = vweird.f32 %v2399_v38 }
 0x441   : > { %v2412_v40 = vor.u32 1.1754944e-38, %v2411_v2  ;;  %vm2410_vm12 = vcmp.eq.f32.partialorder %v2409_v7, 8.507059e+37 }
 0x445   : > { %v2696_v10 = vpop.eup %2695 }
 0x446   : > { %v2401_v9 = vmul.f32 %v2696_v10, %v2399_v38  ;;  %vm2406_vm8 = vweird.f32 %v2696_v10 }
 0x447   : > { %vm2407_vm10 = vmor %vm2405_vm9, %vm2406_vm8 }
 0x448   : > { %v2402_v29 = vsub.f32 1.0, %v2401_v9 }
 0x44a   : > { %v2403_v31 = vmul.f32 %v2696_v10, %v2402_v29 }
 0x44c   : > { %v2404_v60 = vadd.f32 %v2696_v10, %v2403_v31 }
 0x44e   : > { %v2408_v47 = vsel %vm2407_vm10, %v2696_v10, %v2404_v60 }
 0x44f   : > { %v2413_v11 = vsel %vm2410_vm12, %v2412_v40, %v2408_v47 }
 0x450   : > { %2415 = vst [vmem:[%s4490_s11] sm:$0x1] %v2413_v11 }
 0x451 PF: > { %s23_s21 = sadd.s32 1, %s2719_s21   ;;  %s4555_s19 = smov %s2715_s20 }
 0x452   : > { %p20_p8 = scmp.ge.s32.totalorder %s23_s21, 4   ;;  %s4556_s20 = smov %s4558_s10 }
 0x454   :  { %22 = sbr.rel (!%p20_p8) target bundleno = 3 (0x3), region = 110 }

</bundles_post_ra>
